<compile_context>
chip_gen: v6e
topology: v6e:2x2x1
jax: 0.10.0
libtpu: 0.0.40
codegen_flags: <defaults>
</compile_context>

<pallas_src>
import functools
import math

import jax
import jax.numpy as jnp
import numpy as np
from jax.experimental import pallas as pl
from jax.experimental.pallas import tpu as pltpu

# Config (the PyTorch module hard-codes the head expansion to 12).
B = 2          # batch
NT = 8         # sequence length
N_HEAD = 12    # number of heads
N_EMBD = 48    # embedding size (divisible by n_head)


def _csa_kernel(x_ref, mask_ref, wqkv_ref, bqkv_ref, wproj_ref, bproj_ref,
                hsum_ref, hexp_ref, repq_ref, repk_ref, sumj_ref, o_ref,
                *, batch, seq, n_head):
    """Whole forward (all batches, all heads) in a single grid step.

    x_ref    : (B*nT, C)        fused activations
    mask_ref : (B, nT, 1)       1 = keep, 0 = masked (key positions)
    wqkv_ref : (3, C, C)        pre-transposed per-part c_attn weights (y = x @ w)
    bqkv_ref : (3, 1, C)        c_attn bias split per part
    wproj_ref: (C, C)           pre-transposed c_proj weight
    bproj_ref: (1, C)           c_proj bias
    hsum_ref : (C, H)           head-sum indicator (scale folded in)
    hexp_ref : (H, C)           head-expansion indicator
    repq_ref : (B*nT*nT, B*nT)  row replication (b,i) -> (b,i,j)
    repk_ref : (B*nT*nT, B*nT)  row replication (b,j) -> (b,i,j)
    sumj_ref : (B*nT, B*nT*nT)  sums pair rows back over j
    o_ref    : (B*nT, C)
    """
    bt = batch * seq

    x = x_ref[...]                                                 # (BT, C)

    # --- fused QKV projection: one lane-aligned matmul per part -----------
    q = jnp.dot(x, wqkv_ref[0], preferred_element_type=jnp.float32) + bqkv_ref[0]
    k = jnp.dot(x, wqkv_ref[1], preferred_element_type=jnp.float32) + bqkv_ref[1]
    v = jnp.dot(x, wqkv_ref[2], preferred_element_type=jnp.float32) + bqkv_ref[2]

    # --- replicate rows into (b, i, j) pair space (constant matmuls) ------
    qe = jnp.dot(repq_ref[...], q, preferred_element_type=jnp.float32)  # (BT*nT, C)
    ke = jnp.dot(repk_ref[...], k, preferred_element_type=jnp.float32)  # (BT*nT, C)
    ve = jnp.dot(repk_ref[...], v, preferred_element_type=jnp.float32)  # (BT*nT, C)

    # --- per-head scores (scale already folded into hsum) -----------------
    scores = jnp.dot(qe * ke, hsum_ref[...],
                     preferred_element_type=jnp.float32)           # (BT*nT, H)

    # --- additive key mask: computed once, large finite negative ----------
    neg = jnp.where(mask_ref[...] < 0.5, jnp.float32(-1e30), jnp.float32(0.0))
    neg = jnp.broadcast_to(neg[:, None, :, :], (batch, seq, seq, 1))
    neg = neg.reshape(bt, seq, 1)                                  # (BT, nTk, 1)

    s3 = scores.reshape(bt, seq, n_head) + neg                     # (BT, nTk, H)

    # --- softmax over the key axis (sublane axis) --------------------------
    m = jnp.max(s3, axis=1, keepdims=True)                         # (BT, 1, H)
    p = jnp.exp(s3 - m)
    l = jnp.sum(p, axis=1, keepdims=True)                          # (BT, 1, H)
    p = p * pl.reciprocal(l, approx=True)                          # (BT, nTk, H)

    # --- expand per-head probs to channels, weight V, sum over keys -------
    pexp = jnp.dot(p.reshape(bt * seq, n_head), hexp_ref[...],
                   preferred_element_type=jnp.float32)             # (BT*nT, C)
    ctx = jnp.dot(sumj_ref[...], pexp * ve,
                  preferred_element_type=jnp.float32)              # (BT, C)

    # --- output projection --------------------------------------------------
    out = jnp.dot(ctx, wproj_ref[...], preferred_element_type=jnp.float32)
    out = out + bproj_ref[...]
    o_ref[...] = out.astype(o_ref.dtype)


def causal_self_attention(x, attn_mask, w_attn, b_attn, w_proj, b_proj,
                          *, n_head):
    """x: (B, nT, C); attn_mask: (B, nT) with 1=keep / 0=masked.
    w_attn: (3C, C), b_attn: (3C,), w_proj: (C, C), b_proj: (C,)  (PyTorch conv.)"""
    b, nt, c = x.shape
    assert c % n_head == 0
    hd = c // n_head
    bt = b * nt

    # ---- wrapper-side layout plumbing (free) --------------------------------
    x2 = x.reshape(bt, c)
    mask3 = attn_mask.astype(jnp.float32).reshape(b, nt, 1)
    wqkv_t = jnp.transpose(w_attn.reshape(3, c, c), (0, 2, 1))   # y = x @ wqkv_t[i]
    bqkv = b_attn.reshape(3, 1, c)
    wproj_t = jnp.transpose(w_proj)                              # (C, C)
    bproj2 = b_proj.reshape(1, c)

    # ---- constant combinatorial matrices ------------------------------------
    head_of_c = np.arange(c) // hd
    hsum = (head_of_c[:, None] == np.arange(n_head)[None, :]).astype(np.float32)
    hsum = hsum * np.float32(1.0 / math.sqrt(hd))        # fold attention scale
    hexp = (np.arange(n_head)[:, None] == head_of_c[None, :]).astype(np.float32)

    r = np.arange(bt * nt)
    q_idx = r // nt                            # (b, i) feeding pair row (b, i, j)
    k_idx = (r // (nt * nt)) * nt + (r % nt)   # (b, j) feeding pair row (b, i, j)
    repq = (q_idx[:, None] == np.arange(bt)[None, :]).astype(np.float32)
    repk = (k_idx[:, None] == np.arange(bt)[None, :]).astype(np.float32)
    sumj = np.ascontiguousarray(repq.T)        # sums pair rows back over j

    kernel = functools.partial(_csa_kernel, batch=b, seq=nt, n_head=n_head)

    out2 = pl.pallas_call(
        kernel,
        out_shape=jax.ShapeDtypeStruct((bt, c), x.dtype),
        grid_spec=pltpu.PrefetchScalarGridSpec(
            num_scalar_prefetch=0,
            grid=(1,),                               # whole forward in one step
            in_specs=[
                pl.BlockSpec((bt, c), lambda i: (0, 0)),            # x
                pl.BlockSpec((b, nt, 1), lambda i: (0, 0, 0)),      # mask
                pl.BlockSpec((3, c, c), lambda i: (0, 0, 0)),       # W_qkv^T
                pl.BlockSpec((3, 1, c), lambda i: (0, 0, 0)),       # b_qkv
                pl.BlockSpec((c, c), lambda i: (0, 0)),             # W_proj^T
                pl.BlockSpec((1, c), lambda i: (0, 0)),             # b_proj
                pl.BlockSpec((c, n_head), lambda i: (0, 0)),        # hsum
                pl.BlockSpec((n_head, c), lambda i: (0, 0)),        # hexp
                pl.BlockSpec((bt * nt, bt), lambda i: (0, 0)),      # repq
                pl.BlockSpec((bt * nt, bt), lambda i: (0, 0)),      # repk
                pl.BlockSpec((bt, bt * nt), lambda i: (0, 0)),      # sumj
            ],
            out_specs=pl.BlockSpec((bt, c), lambda i: (0, 0)),
        ),
        compiler_params=pltpu.CompilerParams(
            dimension_semantics=("arbitrary",)),
        # TODO(synk): on v7x a 2-wide "parallel" leading grid axis over fused
        # rows could use the second TensorCore; kept single-step for v5e/v6e.
    )(x2, mask3, wqkv_t, bqkv, wproj_t, bproj2,
      jnp.asarray(hsum), jnp.asarray(hexp),
      jnp.asarray(repq), jnp.asarray(repk), jnp.asarray(sumj))

    return out2.reshape(b, nt, c)


def reference(x, attn_mask, w_attn, b_attn, w_proj, b_proj, n_head):
    """Pure-JAX replica of the PyTorch forward for verification."""
    b, nt, c = x.shape
    hd = c // n_head
    qkv = x @ w_attn.T + b_attn
    q, k, v = jnp.split(qkv, 3, axis=2)

    def to_heads(t):
        return t.reshape(b, nt, n_head, hd).transpose(0, 2, 1, 3)

    q, k, v = to_heads(q), to_heads(k), to_heads(v)
    attn = (q @ k.transpose(0, 1, 3, 2)) * (1.0 / math.sqrt(hd))
    mask = attn_mask[:, None, None, :]                          # (B,1,1,nT)
    attn = jnp.where(mask == 0, -jnp.inf, attn)
    attn = jax.nn.softmax(attn, axis=-1)
    y = attn @ v                                                # (B,nh,nT,hd)
    y = y.transpose(0, 2, 1, 3).reshape(b, nt, c)
    return y @ w_proj.T + b_proj


if __name__ == "__main__":
    key = jax.random.PRNGKey(0)
    kx, km, kw1, kb1, kw2, kb2 = jax.random.split(key, 6)

    x = jax.random.normal(kx, (B, NT, N_EMBD), dtype=jnp.float32)
    # attn_mask: 1 = attend, 0 = masked; keep position 0 so no row is fully
    # masked (the PyTorch reference would produce NaN there).
    attn_mask = (jax.random.uniform(km, (B, NT)) > 0.3).astype(jnp.float32)
    attn_mask = attn_mask.at[:, 0].set(1.0)

    # PyTorch Linear convention: weight (out, in), bias (out,)
    w_attn = jax.random.normal(kw1, (3 * N_EMBD, N_EMBD), dtype=jnp.float32) * 0.05
    b_attn = jax.random.normal(kb1, (3 * N_EMBD,), dtype=jnp.float32) * 0.05
    w_proj = jax.random.normal(kw2, (N_EMBD, N_EMBD), dtype=jnp.float32) * 0.05
    b_proj = jax.random.normal(kb2, (N_EMBD,), dtype=jnp.float32) * 0.05

    out = causal_self_attention(x, attn_mask, w_attn, b_attn, w_proj, b_proj,
                                n_head=N_HEAD)
    out = jax.block_until_ready(out)

    ref = reference(x, attn_mask, w_attn, b_attn, w_proj, b_proj, N_HEAD)
    # Tolerance accounts for the approximate (EUP) reciprocal in the softmax.
    np.testing.assert_allclose(np.asarray(out), np.asarray(ref),
                               rtol=2e-3, atol=2e-3)
    print("KERNEL_OK")
</pallas_src>

<mosaic_0001>
module attributes {stable_mosaic.version = 11 : i64} {
  func.func @_csa_kernel(%arg0: i32, %arg1: memref<16x48xf32, #tpu.memory_space<vmem>>, %arg2: memref<2x8x1xf32, #tpu.memory_space<vmem>>, %arg3: memref<3x48x48xf32, #tpu.memory_space<vmem>>, %arg4: memref<3x1x48xf32, #tpu.memory_space<vmem>>, %arg5: memref<48x48xf32, #tpu.memory_space<vmem>>, %arg6: memref<1x48xf32, #tpu.memory_space<vmem>>, %arg7: memref<48x12xf32, #tpu.memory_space<vmem>>, %arg8: memref<12x48xf32, #tpu.memory_space<vmem>>, %arg9: memref<128x16xf32, #tpu.memory_space<vmem>>, %arg10: memref<128x16xf32, #tpu.memory_space<vmem>>, %arg11: memref<16x128xf32, #tpu.memory_space<vmem>>, %arg12: memref<16x48xf32, #tpu.memory_space<vmem>>) attributes {dimension_semantics = [#tpu.dimension_semantics<arbitrary>], iteration_bounds = array<i64: 1>, scalar_prefetch = 0 : i64, scratch_operands = 0 : i64, tpu.core_type = #tpu.core_type<tc>, window_params = [{pipeline_mode = #tpu.pipeline_mode<synchronous>, transform_indices = @transform_0, window_bounds = array<i64: 16, 48>}, {pipeline_mode = #tpu.pipeline_mode<synchronous>, transform_indices = @transform_1, window_bounds = array<i64: 2, 8, 1>}, {pipeline_mode = #tpu.pipeline_mode<synchronous>, transform_indices = @transform_2, window_bounds = array<i64: 3, 48, 48>}, {pipeline_mode = #tpu.pipeline_mode<synchronous>, transform_indices = @transform_3, window_bounds = array<i64: 3, 1, 48>}, {pipeline_mode = #tpu.pipeline_mode<synchronous>, transform_indices = @transform_4, window_bounds = array<i64: 48, 48>}, {pipeline_mode = #tpu.pipeline_mode<synchronous>, transform_indices = @transform_5, window_bounds = array<i64: 1, 48>}, {pipeline_mode = #tpu.pipeline_mode<synchronous>, transform_indices = @transform_6, window_bounds = array<i64: 48, 12>}, {pipeline_mode = #tpu.pipeline_mode<synchronous>, transform_indices = @transform_7, window_bounds = array<i64: 12, 48>}, {pipeline_mode = #tpu.pipeline_mode<synchronous>, transform_indices = @transform_8, window_bounds = array<i64: 128, 16>}, {pipeline_mode = #tpu.pipeline_mode<synchronous>, transform_indices = @transform_9, window_bounds = array<i64: 128, 16>}, {pipeline_mode = #tpu.pipeline_mode<synchronous>, transform_indices = @transform_10, window_bounds = array<i64: 16, 128>}, {pipeline_mode = #tpu.pipeline_mode<synchronous>, transform_indices = @transform_11, window_bounds = array<i64: 16, 48>}]} {
    %c0 = arith.constant 0 : index
    %c0_0 = arith.constant 0 : index
    %0 = vector.load %arg1[%c0, %c0_0] : memref<16x48xf32, #tpu.memory_space<vmem>>, vector<16x48xf32>
    %c0_1 = arith.constant 0 : index
    %c0_2 = arith.constant 0 : index
    %c0_3 = arith.constant 0 : index
    %1 = vector.load %arg3[%c0_1, %c0_2, %c0_3] : memref<3x48x48xf32, #tpu.memory_space<vmem>>, vector<1x48x48xf32>
    %2 = vector.shape_cast %1 : vector<1x48x48xf32> to vector<48x48xf32>
    %cst = arith.constant dense<0.000000e+00> : vector<16x48xf32>
    %3 = tpu.matmul %0, %2, %cst {dimension_numbers = #tpu.dot_dimension_numbers<[1], [0], [0], [1], [0, 0, 1, 1], [], []>} : vector<16x48xf32>, vector<48x48xf32>, vector<16x48xf32> -> vector<16x48xf32>
    %c0_4 = arith.constant 0 : index
    %c0_5 = arith.constant 0 : index
    %c0_6 = arith.constant 0 : index
    %4 = vector.load %arg4[%c0_4, %c0_5, %c0_6] : memref<3x1x48xf32, #tpu.memory_space<vmem>>, vector<1x1x48xf32>
    %5 = vector.shape_cast %4 : vector<1x1x48xf32> to vector<1x48xf32>
    %6 = vector.broadcast %5 : vector<1x48xf32> to vector<16x48xf32>
    %7 = arith.addf %3, %6 : vector<16x48xf32>
    %c1 = arith.constant 1 : index
    %c0_7 = arith.constant 0 : index
    %c0_8 = arith.constant 0 : index
    %8 = vector.load %arg3[%c1, %c0_7, %c0_8] : memref<3x48x48xf32, #tpu.memory_space<vmem>>, vector<1x48x48xf32>
    %9 = vector.shape_cast %8 : vector<1x48x48xf32> to vector<48x48xf32>
    %cst_9 = arith.constant dense<0.000000e+00> : vector<16x48xf32>
    %10 = tpu.matmul %0, %9, %cst_9 {dimension_numbers = #tpu.dot_dimension_numbers<[1], [0], [0], [1], [0, 0, 1, 1], [], []>} : vector<16x48xf32>, vector<48x48xf32>, vector<16x48xf32> -> vector<16x48xf32>
    %c1_10 = arith.constant 1 : index
    %c0_11 = arith.constant 0 : index
    %c0_12 = arith.constant 0 : index
    %11 = vector.load %arg4[%c1_10, %c0_11, %c0_12] : memref<3x1x48xf32, #tpu.memory_space<vmem>>, vector<1x1x48xf32>
    %12 = vector.shape_cast %11 : vector<1x1x48xf32> to vector<1x48xf32>
    %13 = vector.broadcast %12 : vector<1x48xf32> to vector<16x48xf32>
    %14 = arith.addf %10, %13 : vector<16x48xf32>
    %c2 = arith.constant 2 : index
    %c0_13 = arith.constant 0 : index
    %c0_14 = arith.constant 0 : index
    %15 = vector.load %arg3[%c2, %c0_13, %c0_14] : memref<3x48x48xf32, #tpu.memory_space<vmem>>, vector<1x48x48xf32>
    %16 = vector.shape_cast %15 : vector<1x48x48xf32> to vector<48x48xf32>
    %cst_15 = arith.constant dense<0.000000e+00> : vector<16x48xf32>
    %17 = tpu.matmul %0, %16, %cst_15 {dimension_numbers = #tpu.dot_dimension_numbers<[1], [0], [0], [1], [0, 0, 1, 1], [], []>} : vector<16x48xf32>, vector<48x48xf32>, vector<16x48xf32> -> vector<16x48xf32>
    %c2_16 = arith.constant 2 : index
    %c0_17 = arith.constant 0 : index
    %c0_18 = arith.constant 0 : index
    %18 = vector.load %arg4[%c2_16, %c0_17, %c0_18] : memref<3x1x48xf32, #tpu.memory_space<vmem>>, vector<1x1x48xf32>
    %19 = vector.shape_cast %18 : vector<1x1x48xf32> to vector<1x48xf32>
    %20 = vector.broadcast %19 : vector<1x48xf32> to vector<16x48xf32>
    %21 = arith.addf %17, %20 : vector<16x48xf32>
    %c0_19 = arith.constant 0 : index
    %c0_20 = arith.constant 0 : index
    %22 = vector.load %arg9[%c0_19, %c0_20] : memref<128x16xf32, #tpu.memory_space<vmem>>, vector<128x16xf32>
    %cst_21 = arith.constant dense<0.000000e+00> : vector<128x48xf32>
    %23 = tpu.matmul %22, %7, %cst_21 {dimension_numbers = #tpu.dot_dimension_numbers<[1], [0], [0], [1], [0, 0, 1, 1], [], []>} : vector<128x16xf32>, vector<16x48xf32>, vector<128x48xf32> -> vector<128x48xf32>
    %c0_22 = arith.constant 0 : index
    %c0_23 = arith.constant 0 : index
    %24 = vector.load %arg10[%c0_22, %c0_23] : memref<128x16xf32, #tpu.memory_space<vmem>>, vector<128x16xf32>
    %cst_24 = arith.constant dense<0.000000e+00> : vector<128x48xf32>
    %25 = tpu.matmul %24, %14, %cst_24 {dimension_numbers = #tpu.dot_dimension_numbers<[1], [0], [0], [1], [0, 0, 1, 1], [], []>} : vector<128x16xf32>, vector<16x48xf32>, vector<128x48xf32> -> vector<128x48xf32>
    %c0_25 = arith.constant 0 : index
    %c0_26 = arith.constant 0 : index
    %26 = vector.load %arg10[%c0_25, %c0_26] : memref<128x16xf32, #tpu.memory_space<vmem>>, vector<128x16xf32>
    %cst_27 = arith.constant dense<0.000000e+00> : vector<128x48xf32>
    %27 = tpu.matmul %26, %21, %cst_27 {dimension_numbers = #tpu.dot_dimension_numbers<[1], [0], [0], [1], [0, 0, 1, 1], [], []>} : vector<128x16xf32>, vector<16x48xf32>, vector<128x48xf32> -> vector<128x48xf32>
    %28 = arith.mulf %23, %25 : vector<128x48xf32>
    %c0_28 = arith.constant 0 : index
    %c0_29 = arith.constant 0 : index
    %29 = vector.load %arg7[%c0_28, %c0_29] : memref<48x12xf32, #tpu.memory_space<vmem>>, vector<48x12xf32>
    %cst_30 = arith.constant dense<0.000000e+00> : vector<128x12xf32>
    %30 = tpu.matmul %28, %29, %cst_30 {dimension_numbers = #tpu.dot_dimension_numbers<[1], [0], [0], [1], [0, 0, 1, 1], [], []>} : vector<128x48xf32>, vector<48x12xf32>, vector<128x12xf32> -> vector<128x12xf32>
    %c0_31 = arith.constant 0 : index
    %c0_32 = arith.constant 0 : index
    %c0_33 = arith.constant 0 : index
    %31 = vector.load %arg2[%c0_31, %c0_32, %c0_33] : memref<2x8x1xf32, #tpu.memory_space<vmem>>, vector<2x8x1xf32>
    %cst_34 = arith.constant 5.000000e-01 : f32
    %32 = vector.broadcast %cst_34 : f32 to vector<2x8x1xf32>
    %33 = arith.cmpf olt, %31, %32 : vector<2x8x1xf32>
    %cst_35 = arith.constant -1.000000e+30 : f32
    %cst_36 = arith.constant 0.000000e+00 : f32
    %34 = vector.broadcast %cst_35 : f32 to vector<2x8x1xf32>
    %35 = vector.broadcast %cst_36 : f32 to vector<2x8x1xf32>
    %36 = arith.select %33, %34, %35 : vector<2x8x1xi1>, vector<2x8x1xf32>
    %37 = vector.shape_cast %36 : vector<2x8x1xf32> to vector<2x1x8x1xf32>
    %38 = vector.shape_cast %37 : vector<2x1x8x1xf32> to vector<2x1x8x1xf32>
    %39 = vector.broadcast %38 : vector<2x1x8x1xf32> to vector<2x8x8x1xf32>
    %40 = vector.shape_cast %39 : vector<2x8x8x1xf32> to vector<16x8x1xf32>
    %41 = vector.shape_cast %30 : vector<128x12xf32> to vector<16x8x12xf32>
    %42 = vector.broadcast %40 : vector<16x8x1xf32> to vector<16x8x12xf32>
    %43 = arith.addf %41, %42 : vector<16x8x12xf32>
    %cst_37 = arith.constant dense<0xFF800000> : vector<16x12xf32>
    %44 = vector.multi_reduction <maximumf>, %43, %cst_37 [1] : vector<16x8x12xf32> to vector<16x12xf32>
    %45 = vector.shape_cast %44 : vector<16x12xf32> to vector<16x1x12xf32>
    %46 = vector.broadcast %45 : vector<16x1x12xf32> to vector<16x8x12xf32>
    %47 = arith.subf %43, %46 : vector<16x8x12xf32>
    %48 = math.exp %47 : vector<16x8x12xf32>
    %cst_38 = arith.constant dense<0.000000e+00> : vector<16x12xf32>
    %49 = vector.multi_reduction <add>, %48, %cst_38 [1] : vector<16x8x12xf32> to vector<16x12xf32>
    %50 = vector.shape_cast %49 : vector<16x12xf32> to vector<16x1x12xf32>
    %51 = tpu.reciprocal %50 {approx = true} : vector<16x1x12xf32> -> vector<16x1x12xf32>
    %52 = vector.broadcast %51 : vector<16x1x12xf32> to vector<16x8x12xf32>
    %53 = arith.mulf %48, %52 : vector<16x8x12xf32>
    %54 = vector.shape_cast %53 : vector<16x8x12xf32> to vector<128x12xf32>
    %c0_39 = arith.constant 0 : index
    %c0_40 = arith.constant 0 : index
    %55 = vector.load %arg8[%c0_39, %c0_40] : memref<12x48xf32, #tpu.memory_space<vmem>>, vector<12x48xf32>
    %cst_41 = arith.constant dense<0.000000e+00> : vector<128x48xf32>
    %56 = tpu.matmul %54, %55, %cst_41 {dimension_numbers = #tpu.dot_dimension_numbers<[1], [0], [0], [1], [0, 0, 1, 1], [], []>} : vector<128x12xf32>, vector<12x48xf32>, vector<128x48xf32> -> vector<128x48xf32>
    %c0_42 = arith.constant 0 : index
    %c0_43 = arith.constant 0 : index
    %57 = vector.load %arg11[%c0_42, %c0_43] : memref<16x128xf32, #tpu.memory_space<vmem>>, vector<16x128xf32>
    %58 = arith.mulf %56, %27 : vector<128x48xf32>
    %cst_44 = arith.constant dense<0.000000e+00> : vector<16x48xf32>
    %59 = tpu.matmul %57, %58, %cst_44 {dimension_numbers = #tpu.dot_dimension_numbers<[1], [0], [0], [1], [0, 0, 1, 1], [], []>} : vector<16x128xf32>, vector<128x48xf32>, vector<16x48xf32> -> vector<16x48xf32>
    %c0_45 = arith.constant 0 : index
    %c0_46 = arith.constant 0 : index
    %60 = vector.load %arg5[%c0_45, %c0_46] : memref<48x48xf32, #tpu.memory_space<vmem>>, vector<48x48xf32>
    %cst_47 = arith.constant dense<0.000000e+00> : vector<16x48xf32>
    %61 = tpu.matmul %59, %60, %cst_47 {dimension_numbers = #tpu.dot_dimension_numbers<[1], [0], [0], [1], [0, 0, 1, 1], [], []>} : vector<16x48xf32>, vector<48x48xf32>, vector<16x48xf32> -> vector<16x48xf32>
    %c0_48 = arith.constant 0 : index
    %c0_49 = arith.constant 0 : index
    %62 = vector.load %arg6[%c0_48, %c0_49] : memref<1x48xf32, #tpu.memory_space<vmem>>, vector<1x48xf32>
    %63 = vector.broadcast %62 : vector<1x48xf32> to vector<16x48xf32>
    %64 = arith.addf %61, %63 : vector<16x48xf32>
    %c0_50 = arith.constant 0 : index
    %c0_51 = arith.constant 0 : index
    %65 = vector.load %arg12[%c0_50, %c0_51] : memref<16x48xf32, #tpu.memory_space<vmem>>, vector<16x48xf32>
    tpu.vector_store %arg12[%c0_50, %c0_51], %64 {strides = array<i32>} : memref<16x48xf32, #tpu.memory_space<vmem>>, vector<16x48xf32>,
    return
  }
  func.func @transform_0(%arg0: i32) -> (i32, i32) {
    %c0_i32 = arith.constant 0 : i32
    %c0_i32_0 = arith.constant 0 : i32
    %c0_i32_1 = arith.constant 0 : i32
    return %c0_i32, %c0_i32_0 : i32, i32
  }
  func.func @transform_1(%arg0: i32) -> (i32, i32, i32) {
    %c0_i32 = arith.constant 0 : i32
    %c0_i32_0 = arith.constant 0 : i32
    %c0_i32_1 = arith.constant 0 : i32
    %c0_i32_2 = arith.constant 0 : i32
    return %c0_i32, %c0_i32_0, %c0_i32_1 : i32, i32, i32
  }
  func.func @transform_2(%arg0: i32) -> (i32, i32, i32) {
    %c0_i32 = arith.constant 0 : i32
    %c0_i32_0 = arith.constant 0 : i32
    %c0_i32_1 = arith.constant 0 : i32
    %c0_i32_2 = arith.constant 0 : i32
    return %c0_i32, %c0_i32_0, %c0_i32_1 : i32, i32, i32
  }
  func.func @transform_3(%arg0: i32) -> (i32, i32, i32) {
    %c0_i32 = arith.constant 0 : i32
    %c0_i32_0 = arith.constant 0 : i32
    %c0_i32_1 = arith.constant 0 : i32
    %c0_i32_2 = arith.constant 0 : i32
    return %c0_i32, %c0_i32_0, %c0_i32_1 : i32, i32, i32
  }
  func.func @transform_4(%arg0: i32) -> (i32, i32) {
    %c0_i32 = arith.constant 0 : i32
    %c0_i32_0 = arith.constant 0 : i32
    %c0_i32_1 = arith.constant 0 : i32
    return %c0_i32, %c0_i32_0 : i32, i32
  }
  func.func @transform_5(%arg0: i32) -> (i32, i32) {
    %c0_i32 = arith.constant 0 : i32
    %c0_i32_0 = arith.constant 0 : i32
    %c0_i32_1 = arith.constant 0 : i32
    return %c0_i32, %c0_i32_0 : i32, i32
  }
  func.func @transform_6(%arg0: i32) -> (i32, i32) {
    %c0_i32 = arith.constant 0 : i32
    %c0_i32_0 = arith.constant 0 : i32
    %c0_i32_1 = arith.constant 0 : i32
    return %c0_i32, %c0_i32_0 : i32, i32
  }
  func.func @transform_7(%arg0: i32) -> (i32, i32) {
    %c0_i32 = arith.constant 0 : i32
    %c0_i32_0 = arith.constant 0 : i32
    %c0_i32_1 = arith.constant 0 : i32
    return %c0_i32, %c0_i32_0 : i32, i32
  }
  func.func @transform_8(%arg0: i32) -> (i32, i32) {
    %c0_i32 = arith.constant 0 : i32
    %c0_i32_0 = arith.constant 0 : i32
    %c0_i32_1 = arith.constant 0 : i32
    return %c0_i32, %c0_i32_0 : i32, i32
  }
  func.func @transform_9(%arg0: i32) -> (i32, i32) {
    %c0_i32 = arith.constant 0 : i32
    %c0_i32_0 = arith.constant 0 : i32
    %c0_i32_1 = arith.constant 0 : i32
    return %c0_i32, %c0_i32_0 : i32, i32
  }
  func.func @transform_10(%arg0: i32) -> (i32, i32) {
    %c0_i32 = arith.constant 0 : i32
    %c0_i32_0 = arith.constant 0 : i32
    %c0_i32_1 = arith.constant 0 : i32
    return %c0_i32, %c0_i32_0 : i32, i32
  }
  func.func @transform_11(%arg0: i32) -> (i32, i32) {
    %c0_i32 = arith.constant 0 : i32
    %c0_i32_0 = arith.constant 0 : i32
    %c0_i32_1 = arith.constant 0 : i32
    return %c0_i32, %c0_i32_0 : i32, i32
  }
}

</mosaic_0001>

<bundles_post_ra>
// kernel: tpu_custom_call.1
= control target key start
LH: loop header
LB: loop body
LE: loop exit
PB: predicated region body
PF: predicated region fallthrough
CT: control target
= control target key end

     0   :  { %s3014_s0 = inlined_call_operand.vmem [shape: f32[16,48], index: 0, kind: input, shape index: {}]   ;;  %s3015_s1 = inlined_call_operand.vmem [shape: f32[2,8,1], index: 1, kind: input, shape index: {}]   ;;  %s3016_s2 = inlined_call_operand.vmem [shape: f32[3,48,48], index: 2, kind: input, shape index: {}]   ;;  %s3017_s3 = inlined_call_operand.vmem [shape: f32[3,1,48], index: 3, kind: input, shape index: {}]   ;;  %s3018_s4 = inlined_call_operand.vmem [shape: f32[48,48], index: 4, kind: input, shape index: {}]   ;;  %s3019_s5 = inlined_call_operand.vmem [shape: f32[1,48], index: 5, kind: input, shape index: {}]   ;;  %s3020_s6 = inlined_call_operand.vmem [shape: f32[48,12], index: 6, kind: input, shape index: {}]   ;;  %s3021_s7 = inlined_call_operand.vmem [shape: f32[12,48], index: 7, kind: input, shape index: {}]   ;;  %s3022_s8 = inlined_call_operand.vmem [shape: f32[128,16], index: 8, kind: input, shape index: {}]   ;;  %s3023_s9 = inlined_call_operand.vmem [shape: f32[128,16], index: 9, kind: input, shape index: {}]   ;;  %s3024_s10 = inlined_call_operand.vmem [shape: f32[16,128], index: 10, kind: input, shape index: {}]   ;;  %s3025_s11 = inlined_call_operand.hbm [shape: f32[16,48], index: 11, kind: output, shape index: {}]  }
   0x1   :  { %v46_v0 = vld [vmem:[%s3016_s2 + $0x28] sm:$0xff]  ;;  %v1844_v1 = vld [vmem:[%s3016_s2 + $0x58] sm:$0xff]  ;;  %v45_v2 = vld [vmem:[%s3016_s2 + $0x20] sm:$0xff] }
   0x2   :  { %2087 = vmatprep.subr.mxu0 %v46_v0  ;;  %2102 = vmatprep.subr.mxu1 %v1844_v1  ;;  %v1843_v3 = vld [vmem:[%s3016_s2 + $0x50] sm:$0xff]  ;;  %v44_v4 = vld [vmem:[%s3016_s2 + $0x18] sm:$0xff]  ;;  %v1842_v5 = vld [vmem:[%s3016_s2 + $0x48] sm:$0xff] }
   0x3   :  { %2088 = vmatpush3.msra.mxu0 %v46_v0  ;;  %2103 = vmatpush3.msra.mxu1 %v1844_v1  ;;  %v43_v6 = vld [vmem:[%s3016_s2 + $0x10] sm:$0xff]  ;;  %v1841_v7 = vld [vmem:[%s3016_s2 + $0x40] sm:$0xff]  ;;  %v42_v8 = vld [vmem:[%s3016_s2 + $0x8] sm:$0xff] }
   0x4   :  { %2089 = vmatprep.subr.mxu0 %v45_v2  ;;  %2104 = vmatprep.subr.mxu1 %v1843_v3  ;;  %v1840_v9 = vld [vmem:[%s3016_s2 + $0x38] sm:$0xff] }
   0x5   :  { %2090 = vmatpush3.msra.mxu0 %v45_v2  ;;  %2105 = vmatpush3.msra.mxu1 %v1843_v3 }
   0x6   :  { %2091 = vmatprep.subr.mxu0 %v44_v4  ;;  %2106 = vmatprep.subr.mxu1 %v1842_v5 }
   0x7   :  { %2092 = vmatpush3.msra.mxu0 %v44_v4  ;;  %2107 = vmatpush3.msra.mxu1 %v1842_v5 }
   0x8   :  { %16 = vsyncpa [#allocation3], 0  ;;  %2093 = vmatprep.subr.mxu0 %v43_v6  ;;  %2108 = vmatprep.subr.mxu1 %v1841_v7  ;;  %v41_v10 = vld [vmem:[%s3016_s2] sm:$0xff]  ;;  %v1839_v11 = vld [vmem:[%s3016_s2 + $0x30] sm:$0xff]  ;;  %vm54_vm0 = vcmask 392192   ;;  %vm332_vm1 = vcmask 130048  }
   0x9   :  { %2094 = vmatpush3.msra.mxu0 %v43_v6  ;;  %2109 = vmatpush3.msra.mxu1 %v1841_v7  ;;  %v39_v12 = vld [vmem:[%s3014_s0] sm:$0xff]  ;;  %v40_v13 = vld [vmem:[%s3014_s0 + $0x8] sm:$0xff]  ;;  %v1852_v16 = vld [vmem:[%s3016_s2 + $0x78] sm:$0xff]  ;;  %vm1482_vm4 = vcmask 1043456   ;;  %vm1127_vm5 = vcmask 97280  }
   0xa   :  { %2095 = vmatprep.subr.mxu0 %v42_v8  ;;  %2110 = vmatprep.subr.mxu1 %v1840_v9  ;;  %v1854_v14 = vld [vmem:[%s3016_s2 + $0x88] sm:$0xff]  ;;  %v1853_v15 = vld [vmem:[%s3016_s2 + $0x80] sm:$0xff]  ;;  %v1851_v17 = vld [vmem:[%s3016_s2 + $0x70] sm:$0xff] }
   0xb   :  { %2096 = vmatpush3.msra.mxu0 %v42_v8  ;;  %2111 = vmatpush3.msra.mxu1 %v1840_v9  ;;  %v1850_v18 = vld [vmem:[%s3016_s2 + $0x68] sm:$0xff]  ;;  %v1849_v19 = vld [vmem:[%s3016_s2 + $0x60] sm:$0xff]  ;;  %v318_v34 = vld [vmem:[%s3022_s8 + $0x10] sm:$0xff] }
   0xc   :  { %2097 = vmatprep.subr.mxu0 %v41_v10  ;;  %2112 = vmatprep.subr.mxu1 %v1839_v11  ;;  %v316_v20 = vld [vmem:[%s3022_s8] sm:$0xff]  ;;  %v317_v32 = vld [vmem:[%s3022_s8 + $0x8] sm:$0xff]  ;;  %v2584_v35 = vld [vmem:[%s3023_s9 + $0x10] sm:$0xff] }
   0xd   :  { %2098 = vmatpush3.msra.mxu0 %v41_v10  ;;  %2099 = vmatprep.mubr.msk.f32.mxu0 %vm54_vm0, %v39_v12  ;;  %v2559_v21 = vld [vmem:[%s3023_s9] sm:$0xff]  ;;  %v2576_v33 = vld [vmem:[%s3023_s9 + $0x8] sm:$0xff]  ;;  %v319_v37 = vld [vmem:[%s3022_s8 + $0x18] sm:$0xff] }
   0xe   :  { %2113 = vmatpush3.msra.mxu1 %v1839_v11  ;;  %2114 = vmatprep.mubr.msk.f32.mxu1 %vm54_vm0, %v39_v12  ;;  %v1836_v22 = vld [vmem:[%s3017_s3] ss:$0 sm:$0xff]  ;;  %v1846_v23 = vld [vmem:[%s3017_s3 + $0x1] ss:$0 sm:$0xff]  ;;  %v901_v36 = vld [vmem:[%s3020_s6 + $0x28] sm:$0xff]  ;;  %v2422_v11 = vmov 0  }
   0xf   :  { %2100 = vmatmul.mubr.msk.f32.vlgmr.msra.gmra.mxu0 %vm54_vm0, %v40_v13  ;;  %2115 = vmatmul.mubr.msk.f32.vlgmr.msra.gmra.mxu1 %vm54_vm0, %v40_v13  ;;  %v2601_v38 = vld [vmem:[%s3023_s9 + $0x18] sm:$0xff]  ;;  %v320_v39 = vld [vmem:[%s3022_s8 + $0x20] sm:$0xff]  ;;  %v321_v43 = vld [vmem:[%s3022_s8 + $0x28] sm:$0xff] }
  0x10   :  { %2117 = vmatprep.subr.mxu0 %v1854_v14  ;;  %2129 = vmatprep.mubr.msk.f32.mxu0 %vm54_vm0, %v39_v12  ;;  %v2609_v40 = vld [vmem:[%s3023_s9 + $0x20] sm:$0xff]  ;;  %v2629_v44 = vld [vmem:[%s3023_s9 + $0x28] sm:$0xff]  ;;  %v322_v45 = vld [vmem:[%s3022_s8 + $0x30] sm:$0xff]  ;;  %v2423_v12 = vmov 0.0  }
  0x11   :  { %2118 = vmatpush3.msra.mxu0 %v1854_v14  ;;  %2136 = vmatprep.mubr.msk.f32.mxu1 %vm332_vm1, %v316_v20  ;;  %v900_v41 = vld [vmem:[%s3020_s6 + $0x20] sm:$0xff]  ;;  %v2637_v46 = vld [vmem:[%s3023_s9 + $0x30] sm:$0xff]  ;;  %v899_v48 = vld [vmem:[%s3020_s6 + $0x18] sm:$0xff] }
  0x12   :  { %2119 = vmatprep.subr.mxu0 %v1853_v15  ;;  %v1856_v42 = vld [vmem:[%s3017_s3 + $0x2] ss:$0 sm:$0xff]  ;;  %v323_v51 = vld [vmem:[%s3022_s8 + $0x38] sm:$0xff]  ;;  %v898_v56 = vld [vmem:[%s3020_s6 + $0x10] sm:$0xff]  ;;  %2335 = vset.pattern.permute.xlu0 %v2422_v11 }
  0x13   :  { %2120 = vmatpush3.msra.mxu0 %v1853_v15  ;;  %v533_v52 = vld [vmem:[%s3023_s9 + $0x38] sm:$0xff]  ;;  %v324_v53 = vld [vmem:[%s3022_s8 + $0x40] sm:$0xff]  ;;  %v325_v57 = vld [vmem:[%s3022_s8 + $0x48] sm:$0xff] }
  0x14   :  { %2121 = vmatprep.subr.mxu0 %v1852_v16  ;;  %v534_v54 = vld [vmem:[%s3023_s9 + $0x40] sm:$0xff]  ;;  %v535_v58 = vld [vmem:[%s3023_s9 + $0x48] sm:$0xff]  ;;  %v326_v59 = vld [vmem:[%s3022_s8 + $0x50] sm:$0xff] }
  0x15   :  { %2122 = vmatpush3.msra.mxu0 %v1852_v16  ;;  %v536_v60 = vld [vmem:[%s3023_s9 + $0x50] sm:$0xff]  ;;  %v897_v61 = vld [vmem:[%s3020_s6 + $0x8] sm:$0xff]  ;;  %v327_v62 = vld [vmem:[%s3022_s8 + $0x58] sm:$0xff] }
  0x16   :  { %2123 = vmatprep.subr.mxu0 %v1851_v17  ;;  %v537_v63 = vld [vmem:[%s3023_s9 + $0x58] sm:$0xff]  ;;  %v328_v0 = vld [vmem:[%s3022_s8 + $0x60] sm:$0xff]  ;;  %v329_v2 = vld [vmem:[%s3022_s8 + $0x68] sm:$0xff] }
  0x17   :  { %2124 = vmatpush3.msra.mxu0 %v1851_v17  ;;  %v538_v1 = vld [vmem:[%s3023_s9 + $0x60] sm:$0xff]  ;;  %v539_v3 = vld [vmem:[%s3023_s9 + $0x68] sm:$0xff]  ;;  %v330_v4 = vld [vmem:[%s3022_s8 + $0x70] sm:$0xff] }
  0x18   :  { %2125 = vmatprep.subr.mxu0 %v1850_v18  ;;  %v540_v5 = vld [vmem:[%s3023_s9 + $0x70] sm:$0xff]  ;;  %v331_v6 = vld [vmem:[%s3022_s8 + $0x78] sm:$0xff]  ;;  %v896_v8 = vld [vmem:[%s3020_s6] sm:$0xff]  ;;  %s2424_s8 = smov [#allocation2]  }
  0x19   :  { %2126 = vmatpush3.msra.mxu0 %v1850_v18  ;;  %v541_v7 = vld [vmem:[%s3023_s9 + $0x78] sm:$0xff]  ;;  %v1095_v9 = vld [vmem:[%s3015_s1] sm:$0xff]  ;;  %v1096_v10 = vld [vmem:[%s3015_s1 + $0x8] sm:$0xff]  ;;  %s1825_s9 = sshll.u32 %s2424_s8, 4  ;;  %s1826_s9 = int_to_ptr.vmem [resolvable:$true] %s1825_s9 }
  0x1a   :  { %2127 = vmatprep.subr.mxu0 %v1849_v19  ;;  %vm1097_vm2 = vcmp.lt.f32.partialorder %v1095_v9, 0.5  ;;  %vm1098_vm3 = vcmp.lt.f32.partialorder %v1096_v10, 0.5  ;;  %p2405_p1 = scmp.lt.s32.totalorder %s1826_s9, %s1826_s9 }
  0x1b   :  { %2128 = vmatpush3.msra.mxu0 %v1849_v19  ;;  %v1100_v14 = vsel %vm1098_vm3, -1e+30, %v2423_v12 }
  0x1c   :  { %2130 = vmatmul.mubr.msk.f32.vlgmr.msra.gmra.mxu0 %vm54_vm0, %v40_v13  ;;  %v1099_v13 = vsel %vm1097_vm2, -1e+30, %v2423_v12 }
  0x1d   :  { %2164 = vmatprep.mubr.msk.f32.mxu0 %vm332_vm1, %v2559_v21  ;;  %1103 = vperm.xlu0 %2335, %v1099_v13  }
  0x21   :  { %1108 = vperm.xlu0 %2335, %v1100_v14  }
  0xcf   :  { %v2101_v24 = vpop.f32.mrf.mxu0  ;;  %v2116_v25 = vpop.f32.mrf.mxu1 }
  0xd0   :  { %v133_v26 = vadd.f32 %v2101_v24, %v1836_v22  ;;  %v223_v27 = vadd.f32 %v2116_v25, %v1846_v23 }
  0xd1   :  { %v127_v28 = vpop.f32.mrf.mxu0  ;;  %v217_v29 = vpop.f32.mrf.mxu1 }
  0xd2   :  { %v128_v30 = vadd.f32 %v1836_v22, %v127_v28  ;;  %v218_v31 = vadd.f32 %v1846_v23, %v217_v29  ;;  %2132 = vmatprep.subr.mxu1 %v133_v26  ;;  %2160 = vmatprep.subr.mxu0 %v223_v27 }
  0xd3   :  { %2133 = vmatpush3.msra.mxu1 %v133_v26  ;;  %2161 = vmatpush3.msra.mxu0 %v223_v27 }
  0xd4   :  { %2134 = vmatprep.subr.mxu1 %v128_v30  ;;  %2162 = vmatprep.subr.mxu0 %v218_v31 }
  0xd5   :  { %2135 = vmatpush3.msra.mxu1 %v128_v30  ;;  %2163 = vmatpush3.msra.mxu0 %v218_v31 }
  0xd6   :  { %2137 = vmatmul.mubr.msk.f32.vlgmr.msra.gmra.mxu1 %vm332_vm1, %v317_v32  ;;  %2165 = vmatmul.mubr.msk.f32.vlgmr.msra.gmra.mxu0 %vm332_vm1, %v2576_v33 }
  0xd7   :  { %2139 = vmatprep.mubr.msk.f32.mxu1 %vm332_vm1, %v318_v34  ;;  %2167 = vmatprep.mubr.msk.f32.mxu0 %vm332_vm1, %v2584_v35 }
  0xd8   :  { %2216 = vmatprep.subr.mxu0 %v901_v36 }
  0xd9   :  { %2217 = vmatpush3.msra.mxu0 %v901_v36 }
  0xda   :  { %2140 = vmatmul.mubr.msk.f32.gmra.mxu1 %vm332_vm1, %v319_v37  ;;  %2168 = vmatmul.mubr.msk.f32.gmra.mxu0 %vm332_vm1, %v2601_v38 }
  0xdb   :  { %2142 = vmatprep.mubr.msk.f32.mxu1 %vm332_vm1, %v320_v39  ;;  %2170 = vmatprep.mubr.msk.f32.mxu0 %vm332_vm1, %v2609_v40 }
  0xdc   :  { %2218 = vmatprep.subr.mxu0 %v900_v41  ;;  %v2131_v47 = vpop.f32.mrf.mxu0 }
  0xdd   :  { %2219 = vmatpush3.msra.mxu0 %v900_v41  ;;  %v313_v49 = vadd.f32 %v2131_v47, %v1856_v42 }
  0xde   :  { %2143 = vmatmul.mubr.msk.f32.gmra.mxu1 %vm332_vm1, %v321_v43  ;;  %2171 = vmatmul.mubr.msk.f32.gmra.mxu0 %vm332_vm1, %v2629_v44  ;;  %v307_v50 = vpop.f32.mrf.mxu0 }
  0xdf   :  { %2145 = vmatprep.mubr.msk.f32.mxu1 %vm332_vm1, %v322_v45  ;;  %2173 = vmatprep.mubr.msk.f32.mxu0 %vm332_vm1, %v2637_v46  ;;  %v308_v55 = vadd.f32 %v1856_v42, %v307_v50 }
  0xe0   :  { %2220 = vmatprep.subr.mxu0 %v899_v48  ;;  %2188 = vmatprep.subr.mxu1 %v313_v49 }
  0xe1   :  { %2221 = vmatpush3.msra.mxu0 %v899_v48  ;;  %2189 = vmatpush3.msra.mxu1 %v313_v49 }
  0xe2   :  { %2146 = vmatmul.mubr.msk.f32.gmra.mxu1 %vm332_vm1, %v323_v51  ;;  %2174 = vmatmul.mubr.msk.f32.gmra.mxu0 %vm332_vm1, %v533_v52 }
  0xe3   :  { %2148 = vmatprep.mubr.msk.f32.mxu1 %vm332_vm1, %v324_v53  ;;  %2176 = vmatprep.mubr.msk.f32.mxu0 %vm332_vm1, %v534_v54 }
  0xe4   :  { %2222 = vmatprep.subr.mxu0 %v898_v56  ;;  %2190 = vmatprep.subr.mxu1 %v308_v55 }
  0xe5   :  { %2223 = vmatpush3.msra.mxu0 %v898_v56  ;;  %2191 = vmatpush3.msra.mxu1 %v308_v55 }
  0xe6   :  { %2149 = vmatmul.mubr.msk.f32.gmra.mxu1 %vm332_vm1, %v325_v57  ;;  %2177 = vmatmul.mubr.msk.f32.gmra.mxu0 %vm332_vm1, %v535_v58 }
  0xe7   :  { %2151 = vmatprep.mubr.msk.f32.mxu1 %vm332_vm1, %v326_v59  ;;  %2179 = vmatprep.mubr.msk.f32.mxu0 %vm332_vm1, %v536_v60 }
  0xe8   :  { %2224 = vmatprep.subr.mxu0 %v897_v61 }
  0xe9   :  { %2225 = vmatpush3.msra.mxu0 %v897_v61 }
  0xea   :  { %2152 = vmatmul.mubr.msk.f32.gmra.mxu1 %vm332_vm1, %v327_v62  ;;  %2180 = vmatmul.mubr.msk.f32.gmra.mxu0 %vm332_vm1, %v537_v63 }
  0xeb   :  { %2154 = vmatprep.mubr.msk.f32.mxu1 %vm332_vm1, %v328_v0  ;;  %2182 = vmatprep.mubr.msk.f32.mxu0 %vm332_vm1, %v538_v1  ;;  %v1432_v0 = vld [vmem:[%s3021_s7] sm:$0xff] }
  0xec   :  { %2226 = vmatprep.subr.mxu0 %v896_v8 }
  0xed   :  { %2227 = vmatpush3.msra.mxu0 %v896_v8 }
  0xee   :  { %2155 = vmatmul.mubr.msk.f32.gmra.mxu1 %vm332_vm1, %v329_v2  ;;  %2183 = vmatmul.mubr.msk.f32.gmra.mxu0 %vm332_vm1, %v539_v3 }
  0xef   :  { %2157 = vmatprep.mubr.msk.f32.mxu1 %vm332_vm1, %v330_v4  ;;  %2185 = vmatprep.mubr.msk.f32.mxu0 %vm332_vm1, %v540_v5 }
  0xf2   :  { %2158 = vmatmul.mubr.msk.f32.gmra.mxu1 %vm332_vm1, %v331_v6  ;;  %2186 = vmatmul.mubr.msk.f32.gmra.mxu0 %vm332_vm1, %v541_v7 }
  0xf3   :  { %2192 = vmatprep.mubr.msk.f32.mxu1 %vm332_vm1, %v2559_v21 }
  0xf6   :  { %2193 = vmatmul.mubr.msk.f32.vlgmr.msra.gmra.mxu1 %vm332_vm1, %v2576_v33 }
  0xf7   :  { %2195 = vmatprep.mubr.msk.f32.mxu1 %vm332_vm1, %v2584_v35 }
  0xfa   :  { %2196 = vmatmul.mubr.msk.f32.gmra.mxu1 %vm332_vm1, %v2601_v38 }
  0xfb   :  { %2198 = vmatprep.mubr.msk.f32.mxu1 %vm332_vm1, %v2609_v40 }
  0xfe   :  { %2199 = vmatmul.mubr.msk.f32.gmra.mxu1 %vm332_vm1, %v2629_v44 }
  0xff   :  { %2201 = vmatprep.mubr.msk.f32.mxu1 %vm332_vm1, %v2637_v46 }
 0x102   :  { %2202 = vmatmul.mubr.msk.f32.gmra.mxu1 %vm332_vm1, %v533_v52 }
 0x103   :  { %2204 = vmatprep.mubr.msk.f32.mxu1 %vm332_vm1, %v534_v54 }
 0x106   :  { %2205 = vmatmul.mubr.msk.f32.gmra.mxu1 %vm332_vm1, %v535_v58 }
 0x107   :  { %2207 = vmatprep.mubr.msk.f32.mxu1 %vm332_vm1, %v536_v60 }
 0x10a   :  { %2208 = vmatmul.mubr.msk.f32.gmra.mxu1 %vm332_vm1, %v537_v63  ;;  %v1433_v63 = vld [vmem:[%s3021_s7 + $0x8] sm:$0xf] }
 0x10b   :  { %2210 = vmatprep.mubr.msk.f32.mxu1 %vm332_vm1, %v538_v1  ;;  %2252 = vmatprep.subr.msk.mxu1 %vm1482_vm4, %v1433_v63  ;;  %v1104_v1 = vpop.permute.xlu0 %1103 }
 0x10c   :  { %2253 = vmatpush3.msk.msra.mxu1 %vm1482_vm4, %v1433_v63 }
 0x10d   :  { %2254 = vmatprep.subr.mxu1 %v1432_v0 }
 0x10e   :  { %2211 = vmatmul.mubr.msk.f32.gmra.mxu1 %vm332_vm1, %v539_v3 }
 0x10f   :  { %2213 = vmatprep.mubr.msk.f32.mxu1 %vm332_vm1, %v540_v5  ;;  %2255 = vmatpush3.msra.mxu1 %v1432_v0 }
 0x112   :  { %2214 = vmatmul.mubr.msk.f32.gmra.mxu1 %vm332_vm1, %v541_v7 }
 0x196   :  { %v2138_v15 = vpop.f32.mrf.mxu1  ;;  %v2166_v16 = vpop.f32.mrf.mxu0 }
 0x197   :  { %v881_v20 = vmul.f32 %v2166_v16, %v2138_v15 }
 0x198   :  { %v447_v17 = vpop.f32.mrf.mxu1  ;;  %v656_v18 = vpop.f32.mrf.mxu0 }
 0x199   :  { %v880_v19 = vmul.f32 %v656_v18, %v447_v17 }
 0x19a   :  { %v2141_v21 = vpop.f32.mrf.mxu1  ;;  %v2169_v22 = vpop.f32.mrf.mxu0 }
 0x19b   :  { %2228 = vmatprep.mubr.msk.f32.mxu0 %vm54_vm0, %v880_v19  ;;  %v883_v26 = vmul.f32 %v2169_v22, %v2141_v21 }
 0x19c   :  { %v457_v23 = vpop.f32.mrf.mxu1  ;;  %v666_v24 = vpop.f32.mrf.mxu0  ;;  %2229 = vmatmul.mubr.msk.f32.vlgmr.msra.gmra.mxu0 %vm54_vm0, %v881_v20 }
 0x19d   :  { %v882_v25 = vmul.f32 %v666_v24, %v457_v23 }
 0x19e   :  { %v2144_v27 = vpop.f32.mrf.mxu1  ;;  %v2172_v28 = vpop.f32.mrf.mxu0 }
 0x19f   :  { %2231 = vmatprep.mubr.msk.f32.mxu0 %vm54_vm0, %v882_v25  ;;  %v885_v32 = vmul.f32 %v2172_v28, %v2144_v27 }
 0x1a0   :  { %v467_v29 = vpop.f32.mrf.mxu1  ;;  %v676_v30 = vpop.f32.mrf.mxu0  ;;  %2232 = vmatmul.mubr.msk.f32.gmra.mxu0 %vm54_vm0, %v883_v26 }
 0x1a1   :  { %v884_v31 = vmul.f32 %v676_v30, %v467_v29 }
 0x1a2   :  { %v2147_v33 = vpop.f32.mrf.mxu1  ;;  %v2175_v34 = vpop.f32.mrf.mxu0 }
 0x1a3   :  { %2234 = vmatprep.mubr.msk.f32.mxu0 %vm54_vm0, %v884_v31  ;;  %v887_v38 = vmul.f32 %v2175_v34, %v2147_v33 }
 0x1a4   :  { %v477_v35 = vpop.f32.mrf.mxu1  ;;  %v686_v36 = vpop.f32.mrf.mxu0  ;;  %2235 = vmatmul.mubr.msk.f32.gmra.mxu0 %vm54_vm0, %v885_v32 }
 0x1a5   :  { %v886_v37 = vmul.f32 %v686_v36, %v477_v35 }
 0x1a6   :  { %v2150_v39 = vpop.f32.mrf.mxu1  ;;  %v2178_v40 = vpop.f32.mrf.mxu0 }
 0x1a7   :  { %2237 = vmatprep.mubr.msk.f32.mxu0 %vm54_vm0, %v886_v37  ;;  %v889_v44 = vmul.f32 %v2178_v40, %v2150_v39 }
 0x1a8   :  { %v487_v41 = vpop.f32.mrf.mxu1  ;;  %v696_v42 = vpop.f32.mrf.mxu0  ;;  %2238 = vmatmul.mubr.msk.f32.gmra.mxu0 %vm54_vm0, %v887_v38 }
 0x1a9   :  { %v888_v43 = vmul.f32 %v696_v42, %v487_v41 }
 0x1aa   :  { %v2153_v45 = vpop.f32.mrf.mxu1  ;;  %v2181_v46 = vpop.f32.mrf.mxu0 }
 0x1ab   :  { %2240 = vmatprep.mubr.msk.f32.mxu0 %vm54_vm0, %v888_v43  ;;  %v891_v50 = vmul.f32 %v2181_v46, %v2153_v45 }
 0x1ac   :  { %v497_v47 = vpop.f32.mrf.mxu1  ;;  %v706_v48 = vpop.f32.mrf.mxu0  ;;  %2241 = vmatmul.mubr.msk.f32.gmra.mxu0 %vm54_vm0, %v889_v44 }
 0x1ad   :  { %v890_v49 = vmul.f32 %v706_v48, %v497_v47 }
 0x1ae   :  { %v2156_v51 = vpop.f32.mrf.mxu1  ;;  %v2184_v52 = vpop.f32.mrf.mxu0 }
 0x1af   :  { %2243 = vmatprep.mubr.msk.f32.mxu0 %vm54_vm0, %v890_v49  ;;  %v893_v56 = vmul.f32 %v2184_v52, %v2156_v51 }
 0x1b0   :  { %v507_v53 = vpop.f32.mrf.mxu1  ;;  %v716_v54 = vpop.f32.mrf.mxu0  ;;  %2244 = vmatmul.mubr.msk.f32.gmra.mxu0 %vm54_vm0, %v891_v50 }
 0x1b1   :  { %v892_v55 = vmul.f32 %v716_v54, %v507_v53 }
 0x1b2   :  { %v2159_v57 = vpop.f32.mrf.mxu1  ;;  %v2187_v58 = vpop.f32.mrf.mxu0 }
 0x1b3   :  { %2246 = vmatprep.mubr.msk.f32.mxu0 %vm54_vm0, %v892_v55  ;;  %v895_v62 = vmul.f32 %v2187_v58, %v2159_v57 }
 0x1b4   :  { %v517_v59 = vpop.f32.mrf.mxu1  ;;  %v726_v60 = vpop.f32.mrf.mxu0  ;;  %2247 = vmatmul.mubr.msk.f32.gmra.mxu0 %vm54_vm0, %v893_v56 }
 0x1b5   :  { %v894_v61 = vmul.f32 %v726_v60, %v517_v59 }
 0x1b7   :  { %2249 = vmatprep.mubr.msk.f32.mxu0 %vm54_vm0, %v894_v61 }
 0x1b8   :  { %2250 = vmatmul.mubr.msk.f32.gmra.mxu0 %vm54_vm0, %v895_v62 }
 0x25c   :  { %v2230_v2 = vpop.f32.mrf.mxu0 }
 0x25d   :  { %v1112_v3 = vadd.f32 %v2230_v2, %v1104_v1 }
 0x25e   :  { %v1016_v4 = vpop.f32.mrf.mxu0 }
 0x25f   :  { %v1135_v5 = vsel %vm1127_vm5, %v1112_v3, -inf  ;;  %v1111_v6 = vadd.f32 %v1104_v1, %v1016_v4 }
 0x260   :  { %v1136_v7 = vrot.slane %v1135_v5, 4  ;;  %v2233_v8 = vpop.f32.mrf.mxu0 }
 0x261   :  { %v1128_v9 = vsel %vm1127_vm5, %v1111_v6, -inf  ;;  %v2782_v10 = vadd.f32 %v2233_v8, %v1104_v1 }
 0x262   :  { %v1137_v11 = vmax.f32 %v1135_v5, %v1136_v7  ;;  %v1129_v12 = vrot.slane %v1128_v9, 4  ;;  %v1026_v13 = vpop.f32.mrf.mxu0 }
 0x263   :  { %v1149_v14 = vsel %vm1127_vm5, %v2782_v10, -inf  ;;  %v2786_v15 = vadd.f32 %v1104_v1, %v1026_v13 }
 0x264   :  { %v1138_v16 = vrot.slane %v1137_v11, 2  ;;  %v1130_v17 = vmax.f32 %v1128_v9, %v1129_v12  ;;  %v1150_v18 = vrot.slane %v1149_v14, 4  ;;  %v2236_v19 = vpop.f32.mrf.mxu0 }
 0x265   :  { %v1142_v20 = vsel %vm1127_vm5, %v2786_v15, -inf  ;;  %v2790_v21 = vadd.f32 %v2236_v19, %v1104_v1 }
 0x266   :  { %v1139_v22 = vmax.f32 %v1137_v11, %v1138_v16  ;;  %v1131_v23 = vrot.slane %v1130_v17, 2  ;;  %v1151_v24 = vmax.f32 %v1149_v14, %v1150_v18  ;;  %v1143_v25 = vrot.slane %v1142_v20, 4  ;;  %v1036_v26 = vpop.f32.mrf.mxu0 }
 0x267   :  { %v1163_v27 = vsel %vm1127_vm5, %v2790_v21, -inf  ;;  %v2794_v28 = vadd.f32 %v1104_v1, %v1036_v26 }
 0x268   :  { %v1140_v29 = vrot.slane %v1139_v22, 1  ;;  %v1132_v30 = vmax.f32 %v1130_v17, %v1131_v23  ;;  %v1152_v31 = vrot.slane %v1151_v24, 2  ;;  %v1144_v32 = vmax.f32 %v1142_v20, %v1143_v25  ;;  %v2239_v33 = vpop.f32.mrf.mxu0 }
 0x269   :  { %v1164_v34 = vrot.slane %v1163_v27, 4  ;;  %v1156_v35 = vsel %vm1127_vm5, %v2794_v28, -inf  ;;  %v2798_v36 = vadd.f32 %v2239_v33, %v1104_v1 }
 0x26a   :  { %v1141_v37 = vmax.f32 %v1139_v22, %v1140_v29  ;;  %v1133_v38 = vrot.slane %v1132_v30, 1  ;;  %v1153_v39 = vmax.f32 %v1151_v24, %v1152_v31  ;;  %v1145_v40 = vrot.slane %v1144_v32, 2  ;;  %v1046_v41 = vpop.f32.mrf.mxu0 }
 0x26b   :  { %v1165_v42 = vmax.f32 %v1163_v27, %v1164_v34  ;;  %v1157_v43 = vrot.slane %v1156_v35, 4  ;;  %v1177_v44 = vsel %vm1127_vm5, %v2798_v36, -inf  ;;  %v2802_v45 = vadd.f32 %v1104_v1, %v1046_v41 }
 0x26c   :  { %v1241_v46 = vsub.f32 %v1112_v3, %v1141_v37  ;;  %v1134_v47 = vmax.f32 %v1132_v30, %v1133_v38  ;;  %v1154_v48 = vrot.slane %v1153_v39, 1  ;;  %v1146_v49 = vmax.f32 %v1144_v32, %v1145_v40  ;;  %v2242_v50 = vpop.f32.mrf.mxu0  ;;  %v2807_v3 = vpop.permute.xlu0 %1108 }
 0x26d   :  { %v1166_v51 = vrot.slane %v1165_v42, 2  ;;  %v1158_v52 = vmax.f32 %v1156_v35, %v1157_v43  ;;  %v1178_v53 = vrot.slane %v1177_v44, 4  ;;  %v1170_v54 = vsel %vm1127_vm5, %v2802_v45, -inf }
 0x26e   :  { %v1258_v55 = vmul.f32 1.442695, %v1241_v46  ;;  %v1240_v56 = vsub.f32 %v1111_v6, %v1134_v47  ;;  %v1155_v57 = vmax.f32 %v1153_v39, %v1154_v48  ;;  %v1147_v58 = vrot.slane %v1146_v49, 1  ;;  %v1056_v59 = vpop.f32.mrf.mxu0 }
 0x26f   :  { %v1167_v60 = vmax.f32 %v1165_v42, %v1166_v51  ;;  %v1159_v61 = vrot.slane %v1158_v52, 2  ;;  %v1179_v62 = vmax.f32 %v1177_v44, %v1178_v53  ;;  %v1171_v63 = vrot.slane %v1170_v54, 4 }
 0x270   :  { %2336 = vpow2.f32 %v1258_v55  ;;  %v1256_v0 = vmul.f32 1.442695, %v1240_v56  ;;  %v1243_v1 = vsub.f32 %v2782_v10, %v1155_v57  ;;  %v1148_v2 = vmax.f32 %v1146_v49, %v1147_v58  ;;  %v2245_v9 = vpop.f32.mrf.mxu0 }
 0x271   :  { %v1168_v4 = vrot.slane %v1167_v60, 1  ;;  %v1160_v5 = vmax.f32 %v1158_v52, %v1159_v61  ;;  %v1180_v7 = vrot.slane %v1179_v62, 2  ;;  %v1172_v8 = vmax.f32 %v1170_v54, %v1171_v63 }
 0x272   :  { %2338 = vpow2.f32 %v1256_v0  ;;  %v1262_v6 = vmul.f32 1.442695, %v1243_v1  ;;  %v1242_v11 = vsub.f32 %v2786_v15, %v1148_v2  ;;  %v2811_v12 = vadd.f32 %v2242_v50, %v2807_v3  ;;  %v1066_v24 = vpop.f32.mrf.mxu0 }
 0x273   :  { %v1169_v13 = vmax.f32 %v1167_v60, %v1168_v4  ;;  %v1161_v14 = vrot.slane %v1160_v5, 1  ;;  %v1181_v16 = vmax.f32 %v1179_v62, %v1180_v7  ;;  %v1173_v17 = vrot.slane %v1172_v8, 2 }
 0x274   :  { %2340 = vpow2.f32 %v1262_v6  ;;  %v1260_v10 = vmul.f32 1.442695, %v1242_v11  ;;  %v1191_v18 = vsel %vm1127_vm5, %v2811_v12, -inf  ;;  %v2816_v19 = vadd.f32 %v2807_v3, %v1056_v59  ;;  %v2248_v43 = vpop.f32.mrf.mxu0 }
 0x275   :  { %v1245_v20 = vsub.f32 %v2790_v21, %v1169_v13  ;;  %v1162_v22 = vmax.f32 %v1160_v5, %v1161_v14  ;;  %v1182_v23 = vrot.slane %v1181_v16, 1  ;;  %v1174_v15 = vmax.f32 %v1172_v8, %v1173_v17 }
 0x276   :  { %2342 = vpow2.f32 %v1260_v10  ;;  %v1192_v25 = vrot.slane %v1191_v18, 4  ;;  %v1184_v26 = vsel %vm1127_vm5, %v2816_v19, -inf  ;;  %v2822_v27 = vadd.f32 %v2245_v9, %v2807_v3 }
 0x277   :  { %v1266_v29 = vmul.f32 1.442695, %v1245_v20  ;;  %v1244_v30 = vsub.f32 %v2794_v28, %v1162_v22  ;;  %v1183_v31 = vmax.f32 %v1181_v16, %v1182_v23  ;;  %v1175_v32 = vrot.slane %v1174_v15, 1 }
 0x278   :  { %v1193_v33 = vmax.f32 %v1191_v18, %v1192_v25  ;;  %v1185_v34 = vrot.slane %v1184_v26, 4  ;;  %v1205_v21 = vsel %vm1127_vm5, %v2822_v27, -inf  ;;  %v2828_v35 = vadd.f32 %v2807_v3, %v1066_v24 }
 0x279   :  { %2344 = vpow2.f32 %v1266_v29  ;;  %v1264_v37 = vmul.f32 1.442695, %v1244_v30  ;;  %v1247_v38 = vsub.f32 %v2798_v36, %v1183_v31  ;;  %v1176_v39 = vmax.f32 %v1174_v15, %v1175_v32 }
 0x27a   :  { %v1194_v40 = vrot.slane %v1193_v33, 2  ;;  %v1186_v41 = vmax.f32 %v1184_v26, %v1185_v34  ;;  %v1206_v42 = vrot.slane %v1205_v21, 4  ;;  %v1198_v28 = vsel %vm1127_vm5, %v2828_v35, -inf }
 0x27b   :  { %2346 = vpow2.f32 %v1264_v37  ;;  %v1270_v44 = vmul.f32 1.442695, %v1247_v38  ;;  %v1246_v46 = vsub.f32 %v2802_v45, %v1176_v39  ;;  %v1199_v47 = vrot.slane %v1198_v28, 4 }
 0x27c   :  { %v1195_v48 = vmax.f32 %v1193_v33, %v1194_v40  ;;  %v1187_v49 = vrot.slane %v1186_v41, 2  ;;  %v1207_v50 = vmax.f32 %v1205_v21, %v1206_v42  ;;  %v2837_v53 = vadd.f32 %v2248_v43, %v2807_v3 }
 0x27d   :  { %v2834_v51 = vpop.eup %2336  ;;  %2348 = vpow2.f32 %v1270_v44  ;;  %v1268_v36 = vmul.f32 1.442695, %v1246_v46  ;;  %v1200_v52 = vmax.f32 %v1198_v28, %v1199_v47 }
 0x27e   :  { %v1295_v54 = vsel %vm1127_vm5, %v2834_v51, 0.0  ;;  %v1196_v55 = vrot.slane %v1195_v48, 1  ;;  %v1188_v56 = vmax.f32 %v1186_v41, %v1187_v49  ;;  %v1208_v57 = vrot.slane %v1207_v50, 2 }
 0x27f   :  { %v2841_v58 = vpop.eup %2338  ;;  %v1296_v45 = vrot.slane %v1295_v54, 4  ;;  %2350 = vpow2.f32 %v1268_v36  ;;  %v1201_v59 = vrot.slane %v1200_v52, 2  ;;  %v1219_v5 = vsel %vm1127_vm5, %v2837_v53, -inf }
 0x280   :  { %v1288_v60 = vsel %vm1127_vm5, %v2841_v58, 0.0  ;;  %v1197_v61 = vmax.f32 %v1195_v48, %v1196_v55  ;;  %v1189_v62 = vrot.slane %v1188_v56, 1  ;;  %v1209_v63 = vmax.f32 %v1207_v50, %v1208_v57 }
 0x281   :  { %v2845_v0 = vpop.eup %2340  ;;  %v1297_v1 = vadd.f32 %v1296_v45, %v1295_v54  ;;  %v1289_v2 = vrot.slane %v1288_v60, 4  ;;  %v1202_v4 = vmax.f32 %v1200_v52, %v1201_v59  ;;  %v1220_v25 = vrot.slane %v1219_v5, 4 }
 0x282   :  { %v1309_v7 = vsel %vm1127_vm5, %v2845_v0, 0.0  ;;  %v1249_v8 = vsub.f32 %v2811_v12, %v1197_v61  ;;  %v1190_v9 = vmax.f32 %v1188_v56, %v1189_v62  ;;  %v1210_v6 = vrot.slane %v1209_v63, 1  ;;  %v1076_v12 = vpop.f32.mrf.mxu0 }
 0x283   :  { %v2852_v11 = vpop.eup %2342  ;;  %v1298_v13 = vrot.slane %v1297_v1, 2  ;;  %v1290_v14 = vadd.f32 %v1289_v2, %v1288_v60  ;;  %v1310_v16 = vrot.slane %v1309_v7, 4  ;;  %v1203_v17 = vrot.slane %v1202_v4, 1 }
 0x284   :  { %v1302_v10 = vsel %vm1127_vm5, %v2852_v11, 0.0  ;;  %v1274_v18 = vmul.f32 1.442695, %v1249_v8  ;;  %v1248_v20 = vsub.f32 %v2816_v19, %v1190_v9  ;;  %v1211_v22 = vmax.f32 %v1209_v63, %v1210_v6  ;;  %v2251_v42 = vpop.f32.mrf.mxu0 }
 0x285   :  { %v1299_v23 = vadd.f32 %v1298_v13, %v1297_v1  ;;  %v1311_v15 = vadd.f32 %v1310_v16, %v1309_v7  ;;  %v1303_v24 = vrot.slane %v1302_v10, 4  ;;  %v1204_v31 = vmax.f32 %v1202_v4, %v1203_v17 }
 0x286   :  { %v2857_v26 = vpop.eup %2344  ;;  %2352 = vpow2.f32 %v1274_v18  ;;  %v1272_v29 = vmul.f32 1.442695, %v1248_v20  ;;  %v1251_v30 = vsub.f32 %v2822_v27, %v1211_v22  ;;  %v1291_v33 = vrot.slane %v1290_v14, 2  ;;  %v1086_v45 = vpop.f32.mrf.mxu0 }
 0x287   :  { %v1300_v32 = vrot.slane %v1299_v23, 1  ;;  %v1312_v34 = vrot.slane %v1311_v15, 2  ;;  %v1304_v21 = vadd.f32 %v1303_v24, %v1302_v10  ;;  %v1323_v19 = vsel %vm1127_vm5, %v2857_v26, 0.0 }
 0x288   :  { %v2860_v37 = vpop.eup %2346  ;;  %2354 = vpow2.f32 %v1272_v29  ;;  %v1278_v38 = vmul.f32 1.442695, %v1251_v30  ;;  %v1250_v39 = vsub.f32 %v2828_v35, %v1204_v31  ;;  %v2866_v41 = vadd.f32 %v2807_v3, %v1076_v12 }
 0x289   :  { %v1305_v40 = vrot.slane %v1304_v21, 2  ;;  %v1324_v28 = vrot.slane %v1323_v19, 4  ;;  %v1316_v43 = vsel %vm1127_vm5, %v2860_v37, 0.0  ;;  %v1301_v46 = vadd.f32 %v1300_v32, %v1299_v23 }
 0x28a   :  { %v2868_v27 = vpop.eup %2348  ;;  %2356 = vpow2.f32 %v1278_v38  ;;  %v1276_v44 = vmul.f32 1.442695, %v1250_v39  ;;  %v1292_v47 = vadd.f32 %v1291_v33, %v1290_v14  ;;  %v2872_v48 = vadd.f32 %v1312_v34, %v1311_v15 }
 0x28b   :  { %v1317_v49 = vrot.slane %v1316_v43, 4  ;;  %v1325_v35 = vadd.f32 %v1324_v28, %v1323_v19  ;;  %v1337_v36 = vsel %vm1127_vm5, %v2868_v27, 0.0  ;;  %v1221_v52 = vmax.f32 %v1219_v5, %v1220_v25 }
 0x28c   :  { %v2874_v50 = vpop.eup %2350  ;;  %2358 = vpow2.f32 %v1276_v44  ;;  %v2878_v54 = vadd.f32 %v1305_v40, %v1304_v21  ;;  %v1338_v56 = vrot.slane %v1337_v36, 4  ;;  %v1212_v62 = vsel %vm1127_vm5, %v2866_v41, -inf }
 0x28d   :  { %v1318_v55 = vadd.f32 %v1317_v49, %v1316_v43  ;;  %v1330_v57 = vsel %vm1127_vm5, %v2874_v50, 0.0  ;;  %v1326_v59 = vrot.slane %v1325_v35, 2  ;;  %v1222_v61 = vrot.slane %v1221_v52, 2 }
 0x28e   :  { %v1331_v60 = vrot.slane %v1330_v57, 4  ;;  %v1339_v1 = vadd.f32 %v1338_v56, %v1337_v36  ;;  %v1213_v2 = vrot.slane %v1212_v62, 4  ;;  %v2885_v4 = vadd.f32 %v2251_v42, %v2807_v3 }
 0x28f   :  { %v1319_v63 = vrot.slane %v1318_v55, 2  ;;  %v1293_v5 = vrot.slane %v1292_v47, 1  ;;  %v2887_v7 = vadd.f32 %v1326_v59, %v1325_v35  ;;  %v1223_v8 = vmax.f32 %v1221_v52, %v1222_v61 }
 0x290   :  { %v2890_v9 = vadd.f32 %v2807_v3, %v1086_v45  ;;  %2360 = vrcp.f32 %v1301_v46  ;;  %v1332_v6 = vadd.f32 %v1331_v60, %v1330_v57  ;;  %v1214_v13 = vmax.f32 %v1212_v62, %v1213_v2 }
 0x291   :  { %v1233_v14 = vsel %vm1127_vm5, %v2885_v4, -inf  ;;  %v1314_v16 = vrot.slane %v2872_v48, 1  ;;  %v1340_v17 = vrot.slane %v1339_v1, 2  ;;  %v1224_v10 = vrot.slane %v1223_v8, 1 }
 0x292   :  { %v1234_v18 = vrot.slane %v1233_v14, 4  ;;  %v1307_v22 = vrot.slane %v2878_v54, 1  ;;  %v1320_v23 = vadd.f32 %v1319_v63, %v1318_v55  ;;  %v1215_v15 = vrot.slane %v1214_v13, 2 }
 0x293   :  { %v2895_v20 = vpop.eup %2352  ;;  %v1226_v3 = vsel %vm1127_vm5, %v2890_v9, -inf  ;;  %v1328_v24 = vrot.slane %v2887_v7, 1  ;;  %v1225_v12 = vmax.f32 %v1223_v8, %v1224_v10  ;;  %v1333_v31 = vrot.slane %v1332_v6, 2 }
 0x294   :  { %v1351_v25 = vsel %vm1127_vm5, %v2895_v20, 0.0  ;;  %v1235_v29 = vmax.f32 %v1233_v14, %v1234_v18  ;;  %v1216_v33 = vmax.f32 %v1214_v13, %v1215_v15  ;;  %v1227_v34 = vrot.slane %v1226_v3, 4 }
 0x295   :  { %v2903_v30 = vpop.eup %2354  ;;  %v1352_v32 = vrot.slane %v1351_v25, 4  ;;  %v1341_v21 = vadd.f32 %v1340_v17, %v1339_v1  ;;  %v1253_v38 = vsub.f32 %v2837_v53, %v1225_v12  ;;  %v1294_v36 = vadd.f32 %v1293_v5, %v1292_v47 }
 0x296   :  { %v1344_v19 = vsel %vm1127_vm5, %v2903_v30, 0.0  ;;  %v1236_v39 = vrot.slane %v1235_v29, 2  ;;  %v1217_v43 = vrot.slane %v1216_v33, 1  ;;  %v1228_v44 = vmax.f32 %v1226_v3, %v1227_v34 }
 0x297   :  { %v2908_v40 = vpop.eup %2356  ;;  %v1353_v42 = vadd.f32 %v1352_v32, %v1351_v25  ;;  %v1345_v28 = vrot.slane %v1344_v19, 4  ;;  %v1282_v49 = vmul.f32 1.442695, %v1253_v38  ;;  %v1334_v55 = vadd.f32 %v1333_v31, %v1332_v6 }
 0x298   :  { %v1365_v46 = vsel %vm1127_vm5, %v2908_v40, 0.0  ;;  %v1237_v35 = vmax.f32 %v1235_v29, %v1236_v39  ;;  %v1218_v45 = vmax.f32 %v1216_v33, %v1217_v43  ;;  %v1229_v60 = vrot.slane %v1228_v44, 2 }
 0x299   :  { %v2912_v52 = vpop.eup %2358  ;;  %v1346_v56 = vadd.f32 %v1345_v28, %v1344_v19  ;;  %v1366_v57 = vrot.slane %v1365_v46, 4  ;;  %2362 = vpow2.f32 %v1282_v49  ;;  %v1354_v61 = vrot.slane %v1353_v42, 2 }
 0x29a   :  { %v1358_v53 = vsel %vm1127_vm5, %v2912_v52, 0.0  ;;  %v1238_v59 = vrot.slane %v1237_v35, 1  ;;  %v1252_v2 = vsub.f32 %v2866_v41, %v1218_v45  ;;  %v1230_v47 = vmax.f32 %v1228_v44, %v1229_v60 }
 0x29b   :  { %v1347_v62 = vrot.slane %v1346_v56, 2  ;;  %v1367_v63 = vadd.f32 %v1366_v57, %v1365_v46  ;;  %v1359_v1 = vrot.slane %v1358_v53, 4  ;;  %2364 = vrcp.f32 %v1294_v36 }
 0x29c   :  { %v1239_v8 = vmax.f32 %v1237_v35, %v1238_v59  ;;  %v1321_v5 = vrot.slane %v1320_v23, 1  ;;  %v1342_v6 = vrot.slane %v1341_v21, 1  ;;  %v1335_v10 = vrot.slane %v1334_v55, 1 }
 0x29d   :  { %v1348_v13 = vadd.f32 %v1347_v62, %v1346_v56  ;;  %v1360_v14 = vadd.f32 %v1359_v1, %v1358_v53  ;;  %v2361_v17 = vpop.eup %2360  ;;  %v1280_v18 = vmul.f32 1.442695, %v1252_v2  ;;  %v1231_v3 = vrot.slane %v1230_v47, 1 }
 0x29e   :  { %v1255_v15 = vsub.f32 %v2885_v4, %v1239_v8  ;;  %v1355_v25 = vadd.f32 %v1354_v61, %v1353_v42  ;;  %v1368_v12 = vrot.slane %v1367_v63, 2  ;;  %v1308_v31 = vadd.f32 %v1307_v22, %v2878_v54 }
 0x29f   :  { %v1361_v29 = vrot.slane %v1360_v14, 2  ;;  %2366 = vpow2.f32 %v1280_v18  ;;  %v1232_v32 = vmax.f32 %v1230_v47, %v1231_v3  ;;  %v1315_v33 = vadd.f32 %v1314_v16, %v2872_v48 }
 0x2a0   :  { %v1286_v41 = vmul.f32 1.442695, %v1255_v15  ;;  %v1349_v34 = vrot.slane %v1348_v13, 1  ;;  %2368 = vrcp.f32 %v1308_v31  ;;  %v1322_v38 = vadd.f32 %v1321_v5, %v1320_v23 }
 0x2a1   :  { %v1362_v19 = vadd.f32 %v1361_v29, %v1360_v14  ;;  %v1254_v4 = vsub.f32 %v2890_v9, %v1232_v32  ;;  %v1329_v39 = vadd.f32 %v1328_v24, %v2887_v7  ;;  %v1336_v42 = vadd.f32 %v1335_v10, %v1334_v55 }
 0x2a2   :  { %2370 = vpow2.f32 %v1286_v41  ;;  %v1343_v22 = vadd.f32 %v1342_v6, %v1341_v21  ;;  %v1356_v43 = vrot.slane %v1355_v25, 1  ;;  %v1369_v44 = vadd.f32 %v1368_v12, %v1367_v63 }
 0x2a3   :  { %2372 = vrcp.f32 %v1315_v33  ;;  %v1363_v28 = vrot.slane %v1362_v19, 1  ;;  %v1284_v54 = vmul.f32 1.442695, %v1254_v4  ;;  %v1350_v46 = vadd.f32 %v1349_v34, %v1348_v13 }
 0x2a4   :  { %2374 = vrcp.f32 %v1322_v38  ;;  %v1370_v23 = vrot.slane %v1369_v44, 1  ;;  %v1357_v49 = vadd.f32 %v1356_v43, %v1355_v25  ;;  %v1417_v36 = vmul.f32 %v2361_v17, %v2834_v51 }
 0x2a5   :  { %2376 = vrcp.f32 %v1329_v39  ;;  %v1364_v9 = vadd.f32 %v1363_v28, %v1362_v19 }
 0x2a6   :  { %2378 = vpow2.f32 %v1284_v54  ;;  %v2924_v48 = vpop.eup %2362  ;;  %v1371_v57 = vadd.f32 %v1370_v23, %v1369_v44 }
 0x2a7   :  { %2380 = vrcp.f32 %v1336_v42  ;;  %v1379_v16 = vsel %vm1127_vm5, %v2924_v48, 0.0 }
 0x2a8   :  { %2382 = vrcp.f32 %v1343_v22  ;;  %v2365_v7 = vpop.eup %2364  ;;  %v1380_v24 = vrot.slane %v1379_v16, 4 }
 0x2a9   :  { %2384 = vrcp.f32 %v1350_v46  ;;  %v1416_v21 = vmul.f32 %v2365_v7, %v2841_v58 }
 0x2aa   :  { %v1381_v35 = vadd.f32 %v1380_v24, %v1379_v16  ;;  %2386 = vrcp.f32 %v1364_v9 }
 0x2ab   :  { %2256 = vmatprep.mubr.msk.f32.mxu1 %vm1127_vm5, %v1416_v21  ;;  %2388 = vrcp.f32 %v1357_v49 }
 0x2ac   :  { %v2931_v55 = vpop.eup %2366  ;;  %v1382_v56 = vrot.slane %v1381_v35, 2  ;;  %2257 = vmatmul.mubr.msk.f32.vlgmr.msra.gmra.mxu1 %vm1127_vm5, %v1417_v36  ;;  %2390 = vrcp.f32 %v1371_v57 }
 0x2ad   :  { %v2369_v45 = vpop.eup %2368  ;;  %v1372_v53 = vsel %vm1127_vm5, %v2931_v55, 0.0 }
 0x2ae   :  { %v1383_v58 = vadd.f32 %v1382_v56, %v1381_v35  ;;  %v1373_v60 = vrot.slane %v1372_v53, 4  ;;  %v1418_v51 = vmul.f32 %v2369_v45, %v2852_v11 }
 0x2af   :  { %v2936_v59 = vpop.eup %2370 }
 0x2b0   :  { %v2373_v61 = vpop.eup %2372  ;;  %v1393_v62 = vsel %vm1127_vm5, %v2936_v59, 0.0  ;;  %v1374_v1 = vadd.f32 %v1373_v60, %v1372_v53  ;;  %2259 = vmatprep.mubr.msk.f32.mxu1 %vm1127_vm5, %v1418_v51  ;;  %v1384_v5 = vrot.slane %v1383_v58, 1 }
 0x2b1   :  { %v2375_v63 = vpop.eup %2374  ;;  %v1394_v2 = vrot.slane %v1393_v62, 4  ;;  %v1419_v8 = vmul.f32 %v2373_v61, %v2845_v0 }
 0x2b2   :  { %v2377_v47 = vpop.eup %2376  ;;  %v1420_v6 = vmul.f32 %v2375_v63, %v2860_v37  ;;  %v1375_v14 = vrot.slane %v1374_v1, 2  ;;  %v1385_v37 = vadd.f32 %v1384_v5, %v1383_v58 }
 0x2b3   :  { %v2379_v13 = vpop.eup %2378  ;;  %v1395_v17 = vadd.f32 %v1394_v2, %v1393_v62  ;;  %2260 = vmatmul.mubr.msk.f32.gmra.mxu1 %vm1127_vm5, %v1419_v8  ;;  %v1421_v18 = vmul.f32 %v2377_v47, %v2857_v26 }
 0x2b4   :  { %v2381_v11 = vpop.eup %2380  ;;  %v1386_v10 = vsel %vm1127_vm5, %v2379_v13, 0.0  ;;  %2262 = vmatprep.mubr.msk.f32.mxu1 %vm1127_vm5, %v1420_v6  ;;  %v1376_v3 = vadd.f32 %v1375_v14, %v1374_v1  ;;  %2392 = vrcp.f32 %v1385_v37 }
 0x2b5   :  { %v2383_v15 = vpop.eup %2382  ;;  %v1396_v0 = vrot.slane %v1395_v17, 2  ;;  %v1387_v25 = vrot.slane %v1386_v10, 4  ;;  %v1422_v12 = vmul.f32 %v2381_v11, %v2874_v50 }
 0x2b6   :  { %v2385_v29 = vpop.eup %2384  ;;  %v1377_v31 = vrot.slane %v1376_v3, 1  ;;  %v1423_v38 = vmul.f32 %v2383_v15, %v2868_v27 }
 0x2b7   :  { %v1397_v41 = vadd.f32 %v1396_v0, %v1395_v17  ;;  %v1388_v32 = vadd.f32 %v1387_v25, %v1386_v10  ;;  %2263 = vmatmul.mubr.msk.f32.gmra.mxu1 %vm1127_vm5, %v1421_v18  ;;  %v1424_v33 = vmul.f32 %v2385_v29, %v2903_v30  ;;  %v2387_v34 = vpop.eup %2386 }
 0x2b8   :  { %2265 = vmatprep.mubr.msk.f32.mxu1 %vm1127_vm5, %v1422_v12  ;;  %v1378_v4 = vadd.f32 %v1377_v31, %v1376_v3  ;;  %v2389_v39 = vpop.eup %2388  ;;  %v1426_v42 = vmul.f32 %v2387_v34, %v2912_v52 }
 0x2b9   :  { %v1398_v19 = vrot.slane %v1397_v41, 1  ;;  %v1389_v26 = vrot.slane %v1388_v32, 2  ;;  %v1425_v30 = vmul.f32 %v2389_v39, %v2895_v20  ;;  %v2391_v22 = vpop.eup %2390 }
 0x2ba   :  { %2394 = vrcp.f32 %v1378_v4  ;;  %v1427_v27 = vmul.f32 %v2391_v22, %v2908_v40  ;;  %v2968_v40 = vpop.f32.mrf.mxu1  ;;  %v1726_v22 = vld [vmem:[%s3018_s4 + $0x10] sm:$0xff] }
 0x2bb   :  { %v1390_v50 = vadd.f32 %v1389_v26, %v1388_v32  ;;  %2266 = vmatmul.mubr.msk.f32.gmra.mxu1 %vm1127_vm5, %v1423_v38  ;;  %v1399_v28 = vadd.f32 %v1398_v19, %v1397_v41 }
 0x2bc   :  { %2268 = vmatprep.mubr.msk.f32.mxu1 %vm1127_vm5, %v1424_v33  ;;  %v2970_v24 = vpop.f32.mrf.mxu1 }
 0x2bd   :  { %v1391_v54 = vrot.slane %v1390_v50, 1  ;;  %2396 = vrcp.f32 %v1399_v28  ;;  %v1729_v28 = vld [vmem:[%s3018_s4 + $0x28] sm:$0xff] }
 0x2be   :  { %v2975_v49 = vpop.f32.mrf.mxu1 }
 0x2bf   :  { %2269 = vmatmul.mubr.msk.f32.gmra.mxu1 %vm1127_vm5, %v1425_v30  ;;  %v1392_v43 = vadd.f32 %v1391_v54, %v1390_v50  ;;  %v1728_v54 = vld [vmem:[%s3018_s4 + $0x20] sm:$0xff]  ;;  %v1727_v30 = vld [vmem:[%s3018_s4 + $0x18] sm:$0xff] }
 0x2c0   :  { %2271 = vmatprep.mubr.msk.f32.mxu1 %vm1127_vm5, %v1426_v42  ;;  %v2977_v21 = vpop.f32.mrf.mxu1  ;;  %v1632_v42 = vld [vmem:[%s3024_s10 + $0x8] sm:$0xff] }
 0x2c1   :  { %2398 = vrcp.f32 %v1392_v43  ;;  %v2393_v44 = vpop.eup %2392  ;;  %v1725_v43 = vld [vmem:[%s3018_s4 + $0x8] sm:$0xff] }
 0x2c2   :  { %v1429_v16 = vmul.f32 %v2393_v44, %v2924_v48  ;;  %v1631_v48 = vld [vmem:[%s3024_s10] sm:$0xff]  ;;  %v2200_v35 = vpop.f32.mrf.mxu1 }
 0x2c3   :  { %2272 = vmatmul.mubr.msk.f32.gmra.mxu1 %vm1127_vm5, %v1427_v27  ;;  %2312 = vmatprep.mubr.f32.mxu0 %v1631_v48  ;;  %v1724_v27 = vld [vmem:[%s3018_s4] sm:$0xff]  ;;  %s2400_s4 = scalar_lea.vmem %s1826_s9, 256 }
 0x2c4   :  { %v821_v36 = vpop.f32.mrf.mxu1  ;;  %p2401_p0 = scmp.ne.s32.totalorder %s1826_s9, %s2400_s4  ;;  %p2406_p2 = scmp.lt.s32.totalorder %s2400_s4, %s2400_s4 }
 0x2c6   :  { %p2407_p3 = por %p2406_p2, %p2405_p1 }
 0x2c7   :  { %v2395_v46 = vpop.eup %2394 }
 0x2c8   :  { %v1428_v52 = vmul.f32 %v2395_v46, %v2931_v55  ;;  %v2203_v55 = vpop.f32.mrf.mxu1  ;;  %p2408_p4 = pnand %p2407_p3, %p2401_p0 }
 0x2ca   :  { %2274 = vmatprep.mubr.msk.f32.mxu1 %vm1127_vm5, %v1428_v52  ;;  %v2397_v20 = vpop.eup %2396  ;;  %v831_v56 = vpop.f32.mrf.mxu1  ;;  %v1940_v52 = vld [vmem:[%s3019_s5] ss:$0 sm:$0xff] }
 0x2cb   :  { %2275 = vmatmul.mubr.msk.f32.gmra.mxu1 %vm1127_vm5, %v1429_v16  ;;  %v1431_v23 = vmul.f32 %v2397_v20, %v2936_v59 }
 0x2cc   :  { %v2206_v57 = vpop.f32.mrf.mxu1 }
 0x2ce   :  { %v2399_v9 = vpop.eup %2398  ;;  %v841_v45 = vpop.f32.mrf.mxu1 }
 0x2cf   :  { %v1430_v7 = vmul.f32 %v2399_v9, %v2379_v13 }
 0x2d0   :  { %v2209_v53 = vpop.f32.mrf.mxu1 }
 0x2d1   :  { %2277 = vmatprep.mubr.msk.f32.mxu1 %vm1127_vm5, %v1430_v7 }
 0x2d2   :  { %2278 = vmatmul.mubr.msk.f32.gmra.mxu1 %vm1127_vm5, %v1431_v23  ;;  %v851_v59 = vpop.f32.mrf.mxu1 }
 0x2d4   :  { %v2212_v58 = vpop.f32.mrf.mxu1 }
 0x2d6   :  { %v861_v60 = vpop.f32.mrf.mxu1 }
 0x2d8   :  { %v2215_v51 = vpop.f32.mrf.mxu1 }
 0x2da   :  { %v871_v61 = vpop.f32.mrf.mxu1 }
 0x36c   :  { %v2258_v62 = vpop.f32.mrf.mxu1 }
 0x36d   :  { %v1634_v39 = vmul.f32 %v2258_v62, %v2968_v40 }
 0x36e   :  { %v1552_v63 = vpop.f32.mrf.mxu1 }
 0x36f   :  { %v1633_v50 = vmul.f32 %v1552_v63, %v2970_v24 }
 0x373   :  { %v2261_v1 = vpop.f32.mrf.mxu1 }
 0x374   :  { %v1636_v38 = vmul.f32 %v2261_v1, %v2975_v49 }
 0x375   :  { %v1562_v2 = vpop.f32.mrf.mxu1 }
 0x376   :  { %v1635_v4 = vmul.f32 %v1562_v2, %v2977_v21 }
 0x377   :  { %v2264_v8 = vpop.f32.mrf.mxu1 }
 0x378   :  { %v1638_v19 = vmul.f32 %v2264_v8, %v2200_v35 }
 0x379   :  { %v1572_v47 = vpop.f32.mrf.mxu1 }
 0x37a   :  { %v1637_v26 = vmul.f32 %v1572_v47, %v821_v36 }
 0x37b   :  { %v2267_v5 = vpop.f32.mrf.mxu1 }
 0x37c   :  { %v1640_v33 = vmul.f32 %v2267_v5, %v2203_v55 }
 0x37d   :  { %v1582_v6 = vpop.f32.mrf.mxu1 }
 0x37e   :  { %v1639_v34 = vmul.f32 %v1582_v6, %v831_v56 }
 0x37f   :  { %v2270_v13 = vpop.f32.mrf.mxu1 }
 0x380   :  { %v1642_v41 = vmul.f32 %v2270_v13, %v2206_v57 }
 0x381   :  { %v1592_v14 = vpop.f32.mrf.mxu1 }
 0x382   :  { %v1641_v32 = vmul.f32 %v1592_v14, %v841_v45 }
 0x383   :  { %v2273_v17 = vpop.f32.mrf.mxu1 }
 0x384   :  { %v1644_v37 = vmul.f32 %v2273_v17, %v2209_v53 }
 0x385   :  { %v1602_v11 = vpop.f32.mrf.mxu1 }
 0x386   :  { %v1643_v31 = vmul.f32 %v1602_v11, %v851_v59 }
 0x38b   :  { %v2276_v10 = vpop.f32.mrf.mxu1 }
 0x38c   :  { %v1646_v12 = vmul.f32 %v2276_v10, %v2212_v58 }
 0x38d   :  { %v1612_v18 = vpop.f32.mrf.mxu1 }
 0x38e   :  { %v1645_v29 = vmul.f32 %v1612_v18, %v861_v60 }
 0x392   :  { %v2279_v15 = vpop.f32.mrf.mxu1 }
 0x393   :  { %v1648_v3 = vmul.f32 %v2279_v15, %v2215_v51 }
 0x394   :  { %v1622_v0 = vpop.f32.mrf.mxu1 }
 0x395   :  { %v1647_v25 = vmul.f32 %v1622_v0, %v871_v61  ;;  %2280 = vmatprep.subr.mxu0 %v1648_v3 }
 0x396   :  { %2281 = vmatpush3.msra.mxu0 %v1648_v3 }
 0x397   :  { %2282 = vmatprep.subr.mxu0 %v1647_v25 }
 0x398   :  { %2283 = vmatpush3.msra.mxu0 %v1647_v25 }
 0x399   :  { %2284 = vmatprep.subr.mxu0 %v1646_v12 }
 0x39a   :  { %2285 = vmatpush3.msra.mxu0 %v1646_v12 }
 0x39b   :  { %2286 = vmatprep.subr.mxu0 %v1645_v29 }
 0x39c   :  { %2287 = vmatpush3.msra.mxu0 %v1645_v29 }
 0x39d   :  { %2288 = vmatprep.subr.mxu0 %v1644_v37 }
 0x39e   :  { %2289 = vmatpush3.msra.mxu0 %v1644_v37 }
 0x39f   :  { %2290 = vmatprep.subr.mxu0 %v1643_v31 }
 0x3a0   :  { %2291 = vmatpush3.msra.mxu0 %v1643_v31 }
 0x3a1   :  { %2292 = vmatprep.subr.mxu0 %v1642_v41 }
 0x3a2   :  { %2293 = vmatpush3.msra.mxu0 %v1642_v41 }
 0x3a3   :  { %2294 = vmatprep.subr.mxu0 %v1641_v32 }
 0x3a4   :  { %2295 = vmatpush3.msra.mxu0 %v1641_v32 }
 0x3a5   :  { %2296 = vmatprep.subr.mxu0 %v1640_v33 }
 0x3a6   :  { %2297 = vmatpush3.msra.mxu0 %v1640_v33 }
 0x3a7   :  { %2298 = vmatprep.subr.mxu0 %v1639_v34 }
 0x3a8   :  { %2299 = vmatpush3.msra.mxu0 %v1639_v34 }
 0x3a9   :  { %2300 = vmatprep.subr.mxu0 %v1638_v19 }
 0x3aa   :  { %2301 = vmatpush3.msra.mxu0 %v1638_v19 }
 0x3ab   :  { %2302 = vmatprep.subr.mxu0 %v1637_v26 }
 0x3ac   :  { %2303 = vmatpush3.msra.mxu0 %v1637_v26 }
 0x3ad   :  { %2304 = vmatprep.subr.mxu0 %v1636_v38 }
 0x3ae   :  { %2305 = vmatpush3.msra.mxu0 %v1636_v38 }
 0x3af   :  { %2306 = vmatprep.subr.mxu0 %v1635_v4 }
 0x3b0   :  { %2307 = vmatpush3.msra.mxu0 %v1635_v4 }
 0x3b1   :  { %2308 = vmatprep.subr.mxu0 %v1634_v39 }
 0x3b2   :  { %2309 = vmatpush3.msra.mxu0 %v1634_v39 }
 0x3b3   :  { %2310 = vmatprep.subr.mxu0 %v1633_v50 }
 0x3b4   :  { %2311 = vmatpush3.msra.mxu0 %v1633_v50 }
 0x3b5   :  { %2313 = vmatmul.mubr.f32.vlgmr.msra.gmra.mxu0 %v1632_v42  ;;  %2315 = vmatprep.subr.mxu0 %v1729_v28 }
 0x3b6   :  { %2316 = vmatpush3.msra.mxu0 %v1729_v28 }
 0x3b7   :  { %2317 = vmatprep.subr.mxu0 %v1728_v54 }
 0x3b8   :  { %2318 = vmatpush3.msra.mxu0 %v1728_v54 }
 0x3b9   :  { %2319 = vmatprep.subr.mxu0 %v1727_v30 }
 0x3ba   :  { %2320 = vmatpush3.msra.mxu0 %v1727_v30 }
 0x3bb   :  { %2321 = vmatprep.subr.mxu0 %v1726_v22 }
 0x3bc   :  { %2322 = vmatpush3.msra.mxu0 %v1726_v22 }
 0x3bd   :  { %2323 = vmatprep.subr.mxu0 %v1725_v43 }
 0x3be   :  { %2324 = vmatpush3.msra.mxu0 %v1725_v43 }
 0x3bf   :  { %2325 = vmatprep.subr.mxu0 %v1724_v27 }
 0x3c0   :  { %2326 = vmatpush3.msra.mxu0 %v1724_v27 }
 0x475   :  { %v2314_v44 = vpop.f32.mrf.mxu0 }
 0x477   :  { %v1715_v46 = vpop.f32.mrf.mxu0 }
 0x478   :  { %2327 = vmatprep.mubr.msk.f32.mxu0 %vm54_vm0, %v1715_v46 }
 0x479   :  { %2328 = vmatmul.mubr.msk.f32.vlgmr.msra.gmra.mxu0 %vm54_vm0, %v2314_v44 }
 0x539   :  { %v2329_v16 = vpop.f32.mrf.mxu0 }
 0x53a   :  { %v1815_v20 = vadd.f32 %v2329_v16, %v1940_v52 }
 0x53b   :  { %v1809_v9 = vpop.f32.mrf.mxu0 }
 0x53c   :  { %1819 = vst.msk [vmem:[#allocation2 + $0x8] sm:$0xff] %vm54_vm0, %v1815_v20  ;;  %v1810_v7 = vadd.f32 %v1940_v52, %v1809_v9 }
 0x53e   :  { %1818 = vst.msk [vmem:[#allocation2] sm:$0xff] %vm54_vm0, %v1810_v7 }
 0x53f   :  { %2411 = shalt.err (!%p2408_p4)
}
 0x540   :  { %s2425_s12 = smov 128   ;;  %s2426_s5 = smov 8  }
 0x541   :  { %1831 = dma.vmem_to_hbm [thread:$0]  %s1826_s9, 256, %s3025_s11, [#allocation3], %s2425_s12, %s2425_s12, %s2426_s5  }
 0x542   :  { %2420 = dma.done.wait [#allocation3], 256  }
 0x543   :  { %2421 = vsyncadd [#allocation3], 4294967040 }
 0x544   :  { %1835 = vsyncpa [#allocation3], 1 }

</bundles_post_ra>
